<compile_context>
chip_gen: v6e
topology: v6e:2x2x1
jax: 0.10.0
libtpu: 0.0.40
codegen_flags: <defaults>
</compile_context>

<pallas_src>
import functools

import jax
import jax.numpy as jnp
from jax.experimental import pallas as pl
from jax.experimental.pallas import tpu as pltpu

NEG_SLOPE = 0.01  # torch.nn.LeakyReLU default
NUM_CONVS = 4     # conv1 + 3 stacked convs


def _lrelu(v):
    return jnp.where(v > 0, v, NEG_SLOPE * v)


def gcn_critic_kernel(x_ref, adj_ref, w_ref, b_ref, o_ref, *,
                      n_nodes, graphs_per_block):
    """One grid step = `graphs_per_block` graphs, flattened to R = Bt*N rows."""
    rows = graphs_per_block * n_nodes

    h = x_ref[...]                          # (R, P) f32, features padded to P
    a = adj_ref[...]                        # (R, R) block-diag normalized adjacency

    # --- 4 GCN convolutions: h = LeakyReLU(A_hat @ (h @ W_l) + b_l) ---
    for l in range(NUM_CONVS):
        z = jnp.dot(h, w_ref[l], preferred_element_type=jnp.float32)
        z = jnp.dot(a, z, preferred_element_type=jnp.float32) + b_ref[l]
        h = _lrelu(z)

    # --- lin1 + LeakyReLU ---
    h = _lrelu(jnp.dot(h, w_ref[4], preferred_element_type=jnp.float32) + b_ref[4])

    # --- lin2 (no activation before the scatter) ---
    h = jnp.dot(h, w_ref[5], preferred_element_type=jnp.float32) + b_ref[5]

    # --- scatter(reduce='sum') over batch index == per-graph node sum,
    #     done as a single MXU matmul with an iota pooling matrix ---
    g_idx = jax.lax.broadcasted_iota(jnp.int32, (graphs_per_block, rows), 0)
    r_idx = jax.lax.broadcasted_iota(jnp.int32, (graphs_per_block, rows), 1)
    lo = g_idx * n_nodes
    pool = ((r_idx >= lo) & (r_idx < lo + n_nodes)).astype(jnp.float32)
    pooled = jnp.dot(pool, h, preferred_element_type=jnp.float32)   # (Bt, P)

    # --- lin1_after_scatter: real scalar lives in column 0 of the padded slab ---
    val = jnp.dot(pooled, w_ref[6], preferred_element_type=jnp.float32) + b_ref[6]
    o_ref[...] = val[:, 0:1]                # (Bt, 1)


# ----------------------------- JAX glue ------------------------------------


def build_norm_adj(edge_links, n):
    """edge_links (B, 2, E) int (row 0 = src, row 1 = dst).

    Returns (B, n, n) with A_hat = D^-1/2 (A + I) D^-1/2 (PyG gcn_norm with
    add_self_loops=True; multi-edges kept, self-loops collapsed to weight 1).
    """
    b, _, e = edge_links.shape
    src = edge_links[:, 0, :].reshape(-1)
    dst = edge_links[:, 1, :].reshape(-1)
    b_idx = jnp.repeat(jnp.arange(b), e)
    a = jnp.zeros((b, n, n), jnp.float32).at[b_idx, dst, src].add(1.0)
    eye = jnp.eye(n, dtype=jnp.float32)
    a = a * (1.0 - eye) + eye                   # remaining self-loops -> weight 1
    deg = jnp.sum(a, axis=2)                    # in-degree incl. self-loop, >= 1
    dinv = jax.lax.rsqrt(deg)
    return dinv[:, :, None] * a * dinv[:, None, :]


def block_diagonalize(adj, graphs_per_block):
    """(B, N, N) per-graph adjacency -> (B//Bt, Bt*N, Bt*N) block-diagonal."""
    b, n, _ = adj.shape
    nb = b // graphs_per_block
    eye = jnp.eye(graphs_per_block, dtype=adj.dtype)
    a = adj.reshape(nb, graphs_per_block, n, n)
    bd = jnp.einsum('ij,gipq->gipjq', eye, a)
    return bd.reshape(nb, graphs_per_block * n, graphs_per_block * n)


def pack_layers(layers, p):
    """Pack 7 (W, b) pairs into one (7, P, P) weight slab + (7, 1, P) bias slab."""
    ws, bs = [], []
    for w, b in layers:
        fi, fo = w.shape
        wp = jnp.zeros((p, p), jnp.float32).at[:fi, :fo].set(w)
        bp = jnp.zeros((1, p), jnp.float32).at[0, :fo].set(b)
        ws.append(wp)
        bs.append(bp)
    return jnp.stack(ws), jnp.stack(bs)


def init_params(key, c_in, hidden, out_ch):
    """7 layers: conv1, 3 convs, lin1, lin2, lin1_after_scatter (W in (in,out))."""
    ks = jax.random.split(key, 7)

    def lin(k, fi, fo):
        kw, kb = jax.random.split(k)
        bound = 1.0 / jnp.sqrt(fi)
        w = jax.random.uniform(kw, (fi, fo), jnp.float32, -bound, bound)
        b = jax.random.uniform(kb, (fo,), jnp.float32, -bound, bound)
        return w, b

    layers = [lin(ks[0], c_in, hidden)]
    for i in range(3):
        layers.append(lin(ks[1 + i], hidden, hidden))
    layers.append(lin(ks[4], hidden, hidden))      # lin1
    layers.append(lin(ks[5], hidden, out_ch))      # lin2
    layers.append(lin(ks[6], out_ch, 1))           # lin1_after_scatter
    return layers


def gcn_critic_forward(graph_nodes, adj_norm, layers, *, graphs_per_block=None):
    B, N, Cin = graph_nodes.shape
    H = layers[1][0].shape[0]
    out_ch = layers[5][0].shape[1]
    P = max(Cin, H, out_ch, 1)
    L = len(layers)

    # Pick Bt so each grid step has >= 128 rows (fills MXU M dim) and tiles align.
    if graphs_per_block is None:
        graphs_per_block = B
        for cand in range(1, B + 1):
            if B % cand == 0 and cand % 8 == 0 and cand * N >= 128:
                graphs_per_block = cand
                break
    BT = graphs_per_block
    assert B % BT == 0, "batch must be divisible by graphs_per_block"
    nb = B // BT
    R = BT * N

    w_slab, b_slab = pack_layers(layers, P)

    # Node features flattened to (B*N, P), zero-padded on the feature axis.
    x_flat = jnp.zeros((B * N, P), jnp.float32)
    x_flat = x_flat.at[:, :Cin].set(graph_nodes.reshape(B * N, Cin).astype(jnp.float32))

    adj_bd = block_diagonalize(adj_norm.astype(jnp.float32), BT)   # (nb, R, R)

    kernel = functools.partial(gcn_critic_kernel, n_nodes=N, graphs_per_block=BT)

    out = pl.pallas_call(
        kernel,
        out_shape=jax.ShapeDtypeStruct((B, 1), jnp.float32),
        grid=(nb,),
        in_specs=[
            pl.BlockSpec((R, P), lambda g: (g, 0)),                      # node feats
            pl.BlockSpec((pl.Squeezed(), R, R), lambda g: (g, 0, 0)),    # block-diag A_hat
            pl.BlockSpec((L, P, P), lambda g: (0, 0, 0)),                # weight slab (resident)
            pl.BlockSpec((L, 1, P), lambda g: (0, 0, 0)),                # bias slab (resident)
        ],
        out_specs=pl.BlockSpec((BT, 1), lambda g: (g, 0)),
        compiler_params=pltpu.CompilerParams(dimension_semantics=("parallel",)),
    )(x_flat, adj_bd, w_slab, b_slab)
    return out


def reference_forward(graph_nodes, adj_norm, layers):
    """Pure-JAX reference of the torch forward (dense adjacency math)."""
    h = graph_nodes.astype(jnp.float32)
    for l in range(NUM_CONVS):
        w, b = layers[l]
        h = jnp.einsum('bij,bjc->bic', adj_norm, h @ w) + b
        h = jnp.where(h > 0, h, NEG_SLOPE * h)
    w, b = layers[4]
    h = h @ w + b
    h = jnp.where(h > 0, h, NEG_SLOPE * h)
    w, b = layers[5]
    h = h @ w + b
    pooled = jnp.sum(h, axis=1)            # scatter(reduce='sum') over batch index
    w, b = layers[6]
    return pooled @ w + b                  # (B, 1)


if __name__ == "__main__":
    key = jax.random.PRNGKey(0)
    B, N, E = 32, 8, 12          # batch of graphs, nodes/graph, edges/graph
    Cin, H, O = 4, 32, 16        # in_channels, hidden_channels, out_channels

    kp, kn, ke = jax.random.split(key, 3)
    layers = init_params(kp, Cin, H, O)

    graph_nodes = jax.random.normal(kn, (B, N, Cin), jnp.float32)
    graph_edge_links = jax.random.randint(ke, (B, 2, E), 0, N, dtype=jnp.int32)
    graph_edges = jnp.ones((B, E), jnp.float32)   # only used for batch_size in torch

    # TODO(synk): PyG Batch/Data construction + sparse scatter message passing is
    # replaced by a dense per-graph normalized adjacency D^-1/2 (A+I) D^-1/2
    # built in JAX glue; the in-kernel aggregation is a block-diagonal matmul.
    adj_norm = build_norm_adj(graph_edge_links, N)

    values = gcn_critic_forward(graph_nodes, adj_norm, layers)
    values = jax.block_until_ready(values)

    ref = reference_forward(graph_nodes, adj_norm, layers)

    assert values.shape == (B, 1)
    assert bool(jnp.all(jnp.isfinite(values)))
    assert bool(jnp.allclose(values, ref, atol=5e-2, rtol=5e-2))
    print("KERNEL_OK")
</pallas_src>

<mosaic_0001>
module attributes {stable_mosaic.version = 11 : i64} {
  func.func @gcn_critic_kernel(%arg0: i32, %arg1: memref<128x32xf32, #tpu.memory_space<vmem>>, %arg2: memref<1x128x128xf32, #tpu.memory_space<vmem>>, %arg3: memref<7x32x32xf32, #tpu.memory_space<vmem>>, %arg4: memref<7x1x32xf32, #tpu.memory_space<vmem>>, %arg5: memref<16x1xf32, #tpu.memory_space<vmem>>) attributes {dimension_semantics = [#tpu.dimension_semantics<parallel>], iteration_bounds = array<i64: 2>, scalar_prefetch = 0 : i64, scratch_operands = 0 : i64, tpu.core_type = #tpu.core_type<tc>, window_params = [{transform_indices = @transform_0, window_bounds = array<i64: 128, 32>}, {transform_indices = @transform_1, window_bounds = array<i64: 1, 128, 128>}, {pipeline_mode = #tpu.pipeline_mode<synchronous>, transform_indices = @transform_2, window_bounds = array<i64: 7, 32, 32>}, {pipeline_mode = #tpu.pipeline_mode<synchronous>, transform_indices = @transform_3, window_bounds = array<i64: 7, 1, 32>}, {transform_indices = @transform_4, window_bounds = array<i64: 16, 1>}]} {
    %c0 = arith.constant 0 : index
    %c0_0 = arith.constant 0 : index
    %0 = vector.load %arg1[%c0, %c0_0] : memref<128x32xf32, #tpu.memory_space<vmem>>, vector<128x32xf32>
    %c0_1 = arith.constant 0 : index
    %c0_2 = arith.constant 0 : index
    %c0_3 = arith.constant 0 : index
    %1 = vector.load %arg2[%c0_1, %c0_2, %c0_3] : memref<1x128x128xf32, #tpu.memory_space<vmem>>, vector<1x128x128xf32>
    %2 = vector.shape_cast %1 : vector<1x128x128xf32> to vector<128x128xf32>
    %c0_4 = arith.constant 0 : index
    %c0_5 = arith.constant 0 : index
    %c0_6 = arith.constant 0 : index
    %3 = vector.load %arg3[%c0_4, %c0_5, %c0_6] : memref<7x32x32xf32, #tpu.memory_space<vmem>>, vector<1x32x32xf32>
    %4 = vector.shape_cast %3 : vector<1x32x32xf32> to vector<32x32xf32>
    %cst = arith.constant dense<0.000000e+00> : vector<128x32xf32>
    %5 = tpu.matmul %0, %4, %cst {dimension_numbers = #tpu.dot_dimension_numbers<[1], [0], [0], [1], [0, 0, 1, 1], [], []>} : vector<128x32xf32>, vector<32x32xf32>, vector<128x32xf32> -> vector<128x32xf32>
    %cst_7 = arith.constant dense<0.000000e+00> : vector<128x32xf32>
    %6 = tpu.matmul %2, %5, %cst_7 {dimension_numbers = #tpu.dot_dimension_numbers<[1], [0], [0], [1], [0, 0, 1, 1], [], []>} : vector<128x128xf32>, vector<128x32xf32>, vector<128x32xf32> -> vector<128x32xf32>
    %c0_8 = arith.constant 0 : index
    %c0_9 = arith.constant 0 : index
    %c0_10 = arith.constant 0 : index
    %7 = vector.load %arg4[%c0_8, %c0_9, %c0_10] : memref<7x1x32xf32, #tpu.memory_space<vmem>>, vector<1x1x32xf32>
    %8 = vector.shape_cast %7 : vector<1x1x32xf32> to vector<1x32xf32>
    %9 = vector.broadcast %8 : vector<1x32xf32> to vector<128x32xf32>
    %10 = arith.addf %6, %9 : vector<128x32xf32>
    %cst_11 = arith.constant 0.000000e+00 : f32
    %11 = vector.broadcast %cst_11 : f32 to vector<128x32xf32>
    %12 = arith.cmpf ogt, %10, %11 : vector<128x32xf32>
    %cst_12 = arith.constant 0.00999999977 : f32
    %13 = vector.broadcast %cst_12 : f32 to vector<128x32xf32>
    %14 = arith.mulf %13, %10 : vector<128x32xf32>
    %15 = arith.select %12, %10, %14 : vector<128x32xi1>, vector<128x32xf32>
    %c1 = arith.constant 1 : index
    %c0_13 = arith.constant 0 : index
    %c0_14 = arith.constant 0 : index
    %16 = vector.load %arg3[%c1, %c0_13, %c0_14] : memref<7x32x32xf32, #tpu.memory_space<vmem>>, vector<1x32x32xf32>
    %17 = vector.shape_cast %16 : vector<1x32x32xf32> to vector<32x32xf32>
    %cst_15 = arith.constant dense<0.000000e+00> : vector<128x32xf32>
    %18 = tpu.matmul %15, %17, %cst_15 {dimension_numbers = #tpu.dot_dimension_numbers<[1], [0], [0], [1], [0, 0, 1, 1], [], []>} : vector<128x32xf32>, vector<32x32xf32>, vector<128x32xf32> -> vector<128x32xf32>
    %cst_16 = arith.constant dense<0.000000e+00> : vector<128x32xf32>
    %19 = tpu.matmul %2, %18, %cst_16 {dimension_numbers = #tpu.dot_dimension_numbers<[1], [0], [0], [1], [0, 0, 1, 1], [], []>} : vector<128x128xf32>, vector<128x32xf32>, vector<128x32xf32> -> vector<128x32xf32>
    %c1_17 = arith.constant 1 : index
    %c0_18 = arith.constant 0 : index
    %c0_19 = arith.constant 0 : index
    %20 = vector.load %arg4[%c1_17, %c0_18, %c0_19] : memref<7x1x32xf32, #tpu.memory_space<vmem>>, vector<1x1x32xf32>
    %21 = vector.shape_cast %20 : vector<1x1x32xf32> to vector<1x32xf32>
    %22 = vector.broadcast %21 : vector<1x32xf32> to vector<128x32xf32>
    %23 = arith.addf %19, %22 : vector<128x32xf32>
    %cst_20 = arith.constant 0.000000e+00 : f32
    %24 = vector.broadcast %cst_20 : f32 to vector<128x32xf32>
    %25 = arith.cmpf ogt, %23, %24 : vector<128x32xf32>
    %cst_21 = arith.constant 0.00999999977 : f32
    %26 = vector.broadcast %cst_21 : f32 to vector<128x32xf32>
    %27 = arith.mulf %26, %23 : vector<128x32xf32>
    %28 = arith.select %25, %23, %27 : vector<128x32xi1>, vector<128x32xf32>
    %c2 = arith.constant 2 : index
    %c0_22 = arith.constant 0 : index
    %c0_23 = arith.constant 0 : index
    %29 = vector.load %arg3[%c2, %c0_22, %c0_23] : memref<7x32x32xf32, #tpu.memory_space<vmem>>, vector<1x32x32xf32>
    %30 = vector.shape_cast %29 : vector<1x32x32xf32> to vector<32x32xf32>
    %cst_24 = arith.constant dense<0.000000e+00> : vector<128x32xf32>
    %31 = tpu.matmul %28, %30, %cst_24 {dimension_numbers = #tpu.dot_dimension_numbers<[1], [0], [0], [1], [0, 0, 1, 1], [], []>} : vector<128x32xf32>, vector<32x32xf32>, vector<128x32xf32> -> vector<128x32xf32>
    %cst_25 = arith.constant dense<0.000000e+00> : vector<128x32xf32>
    %32 = tpu.matmul %2, %31, %cst_25 {dimension_numbers = #tpu.dot_dimension_numbers<[1], [0], [0], [1], [0, 0, 1, 1], [], []>} : vector<128x128xf32>, vector<128x32xf32>, vector<128x32xf32> -> vector<128x32xf32>
    %c2_26 = arith.constant 2 : index
    %c0_27 = arith.constant 0 : index
    %c0_28 = arith.constant 0 : index
    %33 = vector.load %arg4[%c2_26, %c0_27, %c0_28] : memref<7x1x32xf32, #tpu.memory_space<vmem>>, vector<1x1x32xf32>
    %34 = vector.shape_cast %33 : vector<1x1x32xf32> to vector<1x32xf32>
    %35 = vector.broadcast %34 : vector<1x32xf32> to vector<128x32xf32>
    %36 = arith.addf %32, %35 : vector<128x32xf32>
    %cst_29 = arith.constant 0.000000e+00 : f32
    %37 = vector.broadcast %cst_29 : f32 to vector<128x32xf32>
    %38 = arith.cmpf ogt, %36, %37 : vector<128x32xf32>
    %cst_30 = arith.constant 0.00999999977 : f32
    %39 = vector.broadcast %cst_30 : f32 to vector<128x32xf32>
    %40 = arith.mulf %39, %36 : vector<128x32xf32>
    %41 = arith.select %38, %36, %40 : vector<128x32xi1>, vector<128x32xf32>
    %c3 = arith.constant 3 : index
    %c0_31 = arith.constant 0 : index
    %c0_32 = arith.constant 0 : index
    %42 = vector.load %arg3[%c3, %c0_31, %c0_32] : memref<7x32x32xf32, #tpu.memory_space<vmem>>, vector<1x32x32xf32>
    %43 = vector.shape_cast %42 : vector<1x32x32xf32> to vector<32x32xf32>
    %cst_33 = arith.constant dense<0.000000e+00> : vector<128x32xf32>
    %44 = tpu.matmul %41, %43, %cst_33 {dimension_numbers = #tpu.dot_dimension_numbers<[1], [0], [0], [1], [0, 0, 1, 1], [], []>} : vector<128x32xf32>, vector<32x32xf32>, vector<128x32xf32> -> vector<128x32xf32>
    %cst_34 = arith.constant dense<0.000000e+00> : vector<128x32xf32>
    %45 = tpu.matmul %2, %44, %cst_34 {dimension_numbers = #tpu.dot_dimension_numbers<[1], [0], [0], [1], [0, 0, 1, 1], [], []>} : vector<128x128xf32>, vector<128x32xf32>, vector<128x32xf32> -> vector<128x32xf32>
    %c3_35 = arith.constant 3 : index
    %c0_36 = arith.constant 0 : index
    %c0_37 = arith.constant 0 : index
    %46 = vector.load %arg4[%c3_35, %c0_36, %c0_37] : memref<7x1x32xf32, #tpu.memory_space<vmem>>, vector<1x1x32xf32>
    %47 = vector.shape_cast %46 : vector<1x1x32xf32> to vector<1x32xf32>
    %48 = vector.broadcast %47 : vector<1x32xf32> to vector<128x32xf32>
    %49 = arith.addf %45, %48 : vector<128x32xf32>
    %cst_38 = arith.constant 0.000000e+00 : f32
    %50 = vector.broadcast %cst_38 : f32 to vector<128x32xf32>
    %51 = arith.cmpf ogt, %49, %50 : vector<128x32xf32>
    %cst_39 = arith.constant 0.00999999977 : f32
    %52 = vector.broadcast %cst_39 : f32 to vector<128x32xf32>
    %53 = arith.mulf %52, %49 : vector<128x32xf32>
    %54 = arith.select %51, %49, %53 : vector<128x32xi1>, vector<128x32xf32>
    %c4 = arith.constant 4 : index
    %c0_40 = arith.constant 0 : index
    %c0_41 = arith.constant 0 : index
    %55 = vector.load %arg3[%c4, %c0_40, %c0_41] : memref<7x32x32xf32, #tpu.memory_space<vmem>>, vector<1x32x32xf32>
    %56 = vector.shape_cast %55 : vector<1x32x32xf32> to vector<32x32xf32>
    %cst_42 = arith.constant dense<0.000000e+00> : vector<128x32xf32>
    %57 = tpu.matmul %54, %56, %cst_42 {dimension_numbers = #tpu.dot_dimension_numbers<[1], [0], [0], [1], [0, 0, 1, 1], [], []>} : vector<128x32xf32>, vector<32x32xf32>, vector<128x32xf32> -> vector<128x32xf32>
    %c4_43 = arith.constant 4 : index
    %c0_44 = arith.constant 0 : index
    %c0_45 = arith.constant 0 : index
    %58 = vector.load %arg4[%c4_43, %c0_44, %c0_45] : memref<7x1x32xf32, #tpu.memory_space<vmem>>, vector<1x1x32xf32>
    %59 = vector.shape_cast %58 : vector<1x1x32xf32> to vector<1x32xf32>
    %60 = vector.broadcast %59 : vector<1x32xf32> to vector<128x32xf32>
    %61 = arith.addf %57, %60 : vector<128x32xf32>
    %cst_46 = arith.constant 0.000000e+00 : f32
    %62 = vector.broadcast %cst_46 : f32 to vector<128x32xf32>
    %63 = arith.cmpf ogt, %61, %62 : vector<128x32xf32>
    %cst_47 = arith.constant 0.00999999977 : f32
    %64 = vector.broadcast %cst_47 : f32 to vector<128x32xf32>
    %65 = arith.mulf %64, %61 : vector<128x32xf32>
    %66 = arith.select %63, %61, %65 : vector<128x32xi1>, vector<128x32xf32>
    %c5 = arith.constant 5 : index
    %c0_48 = arith.constant 0 : index
    %c0_49 = arith.constant 0 : index
    %67 = vector.load %arg3[%c5, %c0_48, %c0_49] : memref<7x32x32xf32, #tpu.memory_space<vmem>>, vector<1x32x32xf32>
    %68 = vector.shape_cast %67 : vector<1x32x32xf32> to vector<32x32xf32>
    %cst_50 = arith.constant dense<0.000000e+00> : vector<128x32xf32>
    %69 = tpu.matmul %66, %68, %cst_50 {dimension_numbers = #tpu.dot_dimension_numbers<[1], [0], [0], [1], [0, 0, 1, 1], [], []>} : vector<128x32xf32>, vector<32x32xf32>, vector<128x32xf32> -> vector<128x32xf32>
    %c5_51 = arith.constant 5 : index
    %c0_52 = arith.constant 0 : index
    %c0_53 = arith.constant 0 : index
    %70 = vector.load %arg4[%c5_51, %c0_52, %c0_53] : memref<7x1x32xf32, #tpu.memory_space<vmem>>, vector<1x1x32xf32>
    %71 = vector.shape_cast %70 : vector<1x1x32xf32> to vector<1x32xf32>
    %72 = vector.broadcast %71 : vector<1x32xf32> to vector<128x32xf32>
    %73 = arith.addf %69, %72 : vector<128x32xf32>
    %74 = tpu.iota {dimensions = array<i32: 0>} : vector<16x128xi32>
    %75 = tpu.iota {dimensions = array<i32: 1>} : vector<16x128xi32>
    %c8_i32 = arith.constant 8 : i32
    %76 = vector.broadcast %c8_i32 : i32 to vector<16x128xi32>
    %77 = arith.muli %74, %76 : vector<16x128xi32>
    %78 = arith.cmpi sge, %75, %77 : vector<16x128xi32>
    %c8_i32_54 = arith.constant 8 : i32
    %79 = vector.broadcast %c8_i32_54 : i32 to vector<16x128xi32>
    %80 = arith.addi %77, %79 : vector<16x128xi32>
    %81 = arith.cmpi slt, %75, %80 : vector<16x128xi32>
    %82 = arith.andi %78, %81 : vector<16x128xi1>
    %83 = arith.extui %82 : vector<16x128xi1> to vector<16x128xi32>
    %84 = arith.sitofp %83 : vector<16x128xi32> to vector<16x128xf32>
    %cst_55 = arith.constant dense<0.000000e+00> : vector<16x32xf32>
    %85 = tpu.matmul %84, %73, %cst_55 {dimension_numbers = #tpu.dot_dimension_numbers<[1], [0], [0], [1], [0, 0, 1, 1], [], []>} : vector<16x128xf32>, vector<128x32xf32>, vector<16x32xf32> -> vector<16x32xf32>
    %c6 = arith.constant 6 : index
    %c0_56 = arith.constant 0 : index
    %c0_57 = arith.constant 0 : index
    %86 = vector.load %arg3[%c6, %c0_56, %c0_57] : memref<7x32x32xf32, #tpu.memory_space<vmem>>, vector<1x32x32xf32>
    %87 = vector.shape_cast %86 : vector<1x32x32xf32> to vector<32x32xf32>
    %cst_58 = arith.constant dense<0.000000e+00> : vector<16x32xf32>
    %88 = tpu.matmul %85, %87, %cst_58 {dimension_numbers = #tpu.dot_dimension_numbers<[1], [0], [0], [1], [0, 0, 1, 1], [], []>} : vector<16x32xf32>, vector<32x32xf32>, vector<16x32xf32> -> vector<16x32xf32>
    %c6_59 = arith.constant 6 : index
    %c0_60 = arith.constant 0 : index
    %c0_61 = arith.constant 0 : index
    %89 = vector.load %arg4[%c6_59, %c0_60, %c0_61] : memref<7x1x32xf32, #tpu.memory_space<vmem>>, vector<1x1x32xf32>
    %90 = vector.shape_cast %89 : vector<1x1x32xf32> to vector<1x32xf32>
    %91 = vector.broadcast %90 : vector<1x32xf32> to vector<16x32xf32>
    %92 = arith.addf %88, %91 : vector<16x32xf32>
    %93 = vector.extract_strided_slice %92 {offsets = [0, 0], sizes = [16, 1], strides = [1, 1]} : vector<16x32xf32> to vector<16x1xf32>
    %c0_62 = arith.constant 0 : index
    %c0_63 = arith.constant 0 : index
    %94 = vector.load %arg5[%c0_62, %c0_63] : memref<16x1xf32, #tpu.memory_space<vmem>>, vector<16x1xf32>
    tpu.vector_store %arg5[%c0_62, %c0_63], %93 {strides = array<i32>} : memref<16x1xf32, #tpu.memory_space<vmem>>, vector<16x1xf32>,
    return
  }
  func.func @transform_0(%arg0: i32) -> (i32, i32) {
    %c0_i32 = arith.constant 0 : i32
    %c0_i32_0 = arith.constant 0 : i32
    return %arg0, %c0_i32 : i32, i32
  }
  func.func @transform_1(%arg0: i32) -> (i32, i32, i32) {
    %c0_i32 = arith.constant 0 : i32
    %c0_i32_0 = arith.constant 0 : i32
    %c0_i32_1 = arith.constant 0 : i32
    return %arg0, %c0_i32, %c0_i32_0 : i32, i32, i32
  }
  func.func @transform_2(%arg0: i32) -> (i32, i32, i32) {
    %c0_i32 = arith.constant 0 : i32
    %c0_i32_0 = arith.constant 0 : i32
    %c0_i32_1 = arith.constant 0 : i32
    %c0_i32_2 = arith.constant 0 : i32
    return %c0_i32, %c0_i32_0, %c0_i32_1 : i32, i32, i32
  }
  func.func @transform_3(%arg0: i32) -> (i32, i32, i32) {
    %c0_i32 = arith.constant 0 : i32
    %c0_i32_0 = arith.constant 0 : i32
    %c0_i32_1 = arith.constant 0 : i32
    %c0_i32_2 = arith.constant 0 : i32
    return %c0_i32, %c0_i32_0, %c0_i32_1 : i32, i32, i32
  }
  func.func @transform_4(%arg0: i32) -> (i32, i32) {
    %c0_i32 = arith.constant 0 : i32
    %c0_i32_0 = arith.constant 0 : i32
    return %arg0, %c0_i32 : i32, i32
  }
}

</mosaic_0001>

<bundles_post_ra>
// kernel: tpu_custom_call.1
= control target key start
LH: loop header
LB: loop body
LE: loop exit
PB: predicated region body
PF: predicated region fallthrough
CT: control target
= control target key end

     0   :  { %9 = vsyncpa [#allocation3], 0  ;;  %s3563_s15 = smov 0   ;;  %s3956_s0 = inlined_call_operand.vmem [shape: f32[256,32], index: 0, kind: input, shape index: {}]   ;;  %s3957_s1 = inlined_call_operand.vmem [shape: f32[2,128,128], index: 1, kind: input, shape index: {}]   ;;  %s3958_s2 = inlined_call_operand.hbm [shape: f32[7,32,32], index: 2, kind: input, shape index: {}]   ;;  %s3959_s3 = inlined_call_operand.vmem [shape: f32[7,1,32], index: 3, kind: input, shape index: {}]   ;;  %s3960_s4 = inlined_call_operand.vmem [shape: f32[32,1], index: 4, kind: output, shape index: {}]  }
   0x1 LB: > { %s3569_s16 = sadd.s32 4294967295, %s3532_s15   ;;  %p2596_p0 = scmp.ge.s32.totalorder %s3532_s15, 1  ;;  %s3532_s15 = sphi %s3563_s15, %s15_s15  }
   0x2   : > { %p140_p1 = scmp.lt.s32.totalorder %s3532_s15, 3  ;;  %s3534_s17 = smov [#allocation2]  }
   0x3   : > { %s152_s18 = sshll.u32 %s3534_s17, 4  ;;  %p3467_p3 = scmp.eq.s32.totalorder %s3569_s16, 0  ;;  %s153_s18 = int_to_ptr.vmem [resolvable:$true] %s152_s18 }
   0x4   : > { %p3573_p2 = pnand %p2596_p0, %p140_p1  ;;  %s3507_s20 = scalar_lea.vmem %s153_s18, 3584 }
   0x5   : > { %p3508_p7 = scmp.ne.s32.totalorder %s153_s18, %s3507_s20  ;;  %p3515_p10 = scmp.lt.s32.totalorder %s153_s18, %s153_s18 }
   0x6   : > { %p3463_p4 = pneg %p3573_p2  ;;  %p3516_p11 = scmp.lt.s32.totalorder %s3507_s20, %s3507_s20 }
   0x8   : > { %p3464_p5 = pnand %p3467_p3, %p3463_p4  ;;  %p3517_p12 = por %p3516_p11, %p3515_p10 }
   0xa   : > { %p3498_p6 = pneg %p3464_p5 }
   0xc   : > { %p3510_p8 = pnand %p3508_p7, %p3498_p6 }
   0xe   : > { %p3511_p9 = pneg %p3510_p8 }
  0x10   : > { %p3518_p13 = pnand %p3517_p12, %p3511_p9 }
  0x12   : > { %3521 = shalt.err (!%p3518_p13)
}
  0x13   : > { %s3535_s21 = smov 128   ;;  %s3536_s22 = smov 8  }
  0x14   : > { %3466 = dma.hbm_to_vmem [thread:$0]  (!%p3464_p5), %s3958_s2, 3584, %s153_s18, [#allocation3], %s3535_s21, %s3535_s21, %s3536_s22  }
  0x15   : > { %188 = sbr.rel (%p3573_p2) target bundleno = 2702 (0xa8e), region = 36 }
  0x1a   : > { %3527 = dma.done.wait (%p3467_p3), [#allocation3], 3584  }
  0x1b   : > { %3529 = vsyncadd (%p3467_p3), [#allocation3], 4294963712  ;;  %s2601_s25 = sshll.u32 %s3569_s16, 4  ;;  %vm272_vm0 = vcmask 261120   ;;  %v271_v0 = vld [vmem:[#allocation2 + $0x18] sm:$0xff]  ;;  %v270_v1 = vld [vmem:[#allocation2 + $0x10] sm:$0xff] }
  0x1c   : > { %p220_p0 = scmp.lt.s32.totalorder %s2601_s25, 31  ;;  %2997 = vmatprep.subr.mxu0 %v271_v0  ;;  %v269_v3 = vld [vmem:[#allocation2 + $0x8] sm:$0xff]  ;;  %v268_v4 = vld [vmem:[#allocation2] sm:$0xff]  ;;  %p225_p1 = scmp.lt.s32.totalorder %s3569_s16, 1  ;;  %v670_v21 = vld [vmem:[#allocation2 + $0x38] sm:$0xff] }
  0x1d   : > { %2998 = vmatpush3.msra.mxu0 %v271_v0  ;;  %v669_v22 = vld [vmem:[#allocation2 + $0x30] sm:$0xff]  ;;  %v668_v23 = vld [vmem:[#allocation2 + $0x28] sm:$0xff]  ;;  %v667_v55 = vld [vmem:[#allocation2 + $0x20] sm:$0xff]  ;;  %s2605_s23 = sshll.u32 %s3569_s16, 1 }
  0x1e   : > { %s3965_s25 = smov (!%p220_p0, %s2601_s25), 31  ;;  %2999 = vmatprep.subr.mxu0 %v270_v1  ;;  %v3704_v56 = vld [vmem:[%s3959_s3] ss:$0 sm:$0xff]  ;;  %p231_p2 = scmp.lt.s32.totalorder %s2605_s23, 3 }
  0x1f   : > { %s2602_s26 = sshll.u32 %s3965_s25, 3  ;;  %3000 = vmatpush3.msra.mxu0 %v270_v1 }
  0x20   : > { %s3595_s29 = scalar_lea.vmem %s3956_s0, %s2602_s26  ;;  %3001 = vmatprep.subr.mxu0 %v269_v3  ;;  %s3967_s23 = smov (!%p231_p2, %s2605_s23), 3 }
  0x21   : > { %v236_v2 = vld [vmem:[%s3595_s29] sm:$0xff]  ;;  %3002 = vmatpush3.msra.mxu0 %v269_v3  ;;  %v237_v5 = vld [vmem:[%s3595_s29 + $0x8] sm:$0xff]  ;;  %v238_v6 = vld [vmem:[%s3595_s29 + $0x10] sm:$0xff]  ;;  %s226_s30 = scalar_select %p225_p1, %s3569_s16, 1 }
  0x22   : > { %3005 = vmatprep.mubr.msk.f32.mxu0 %vm272_vm0, %v236_v2  ;;  %3003 = vmatprep.subr.mxu0 %v268_v4  ;;  %v239_v7 = vld [vmem:[%s3595_s29 + $0x18] sm:$0xff]  ;;  %v240_v8 = vld [vmem:[%s3595_s29 + $0x20] sm:$0xff]  ;;  %v241_v9 = vld [vmem:[%s3595_s29 + $0x28] sm:$0xff]  ;;  %s2606_s24 = sshll.u32 %s3967_s23, 3 }
  0x23   : > { %3004 = vmatpush3.msra.mxu0 %v268_v4  ;;  %v242_v10 = vld [vmem:[%s3595_s29 + $0x30] sm:$0xff]  ;;  %v243_v11 = vld [vmem:[%s3595_s29 + $0x38] sm:$0xff]  ;;  %v244_v12 = vld [vmem:[%s3595_s29 + $0x40] sm:$0xff]  ;;  %s2724_s5 = sshll.u32 %s226_s30, 7 }
  0x24   : > { %3006 = vmatmul.mubr.msk.f32.vlgmr.msra.gmra.mxu0 %vm272_vm0, %v237_v5  ;;  %v245_v13 = vld [vmem:[%s3595_s29 + $0x48] sm:$0xff]  ;;  %v246_v14 = vld [vmem:[%s3595_s29 + $0x50] sm:$0xff]  ;;  %v247_v15 = vld [vmem:[%s3595_s29 + $0x58] sm:$0xff]  ;;  %s3634_s8 = scalar_lea.vmem %s3957_s1, %s2724_s5  ;;  %3085 = vmatprep.subr.mxu0 %v670_v21 }
  0x25   : > { %3008 = vmatprep.mubr.msk.f32.mxu0 %vm272_vm0, %v238_v6  ;;  %v248_v16 = vld [vmem:[%s3595_s29 + $0x60] sm:$0xff]  ;;  %v249_v17 = vld [vmem:[%s3595_s29 + $0x68] sm:$0xff]  ;;  %v250_v18 = vld [vmem:[%s3595_s29 + $0x70] sm:$0xff]  ;;  %3086 = vmatpush3.msra.mxu0 %v670_v21 }
  0x26   : > { %v251_v19 = vld [vmem:[%s3595_s29 + $0x78] sm:$0xff]  ;;  %v3637_v20 = vld [vmem:[%s3634_s8] sm:$0xff]  ;;  %3087 = vmatprep.subr.mxu0 %v669_v22  ;;  %v3641_v40 = vld [vmem:[%s3634_s8 + $0x8] sm:$0xff]  ;;  %s234_s29 = scalar_lea.vmem %s3960_s4, %s2606_s24 }
  0x27   : > { %3061 = vmatprep.mubr.f32.mxu1 %v3637_v20  ;;  %3088 = vmatpush3.msra.mxu0 %v669_v22  ;;  %v3644_v41 = vld [vmem:[%s3634_s8 + $0x10] sm:$0xff]  ;;  %v3649_v42 = vld [vmem:[%s3634_s8 + $0x18] sm:$0xff]  ;;  %v3652_v43 = vld [vmem:[%s3634_s8 + $0x20] sm:$0xff] }
  0x28   : > { %3009 = vmatmul.mubr.msk.f32.gmra.mxu0 %vm272_vm0, %v239_v7  ;;  %3089 = vmatprep.subr.mxu0 %v668_v23  ;;  %v3657_v44 = vld [vmem:[%s3634_s8 + $0x28] sm:$0xff]  ;;  %v3660_v45 = vld [vmem:[%s3634_s8 + $0x30] sm:$0xff]  ;;  %v3665_v46 = vld [vmem:[%s3634_s8 + $0x38] sm:$0xff] }
  0x29   : > { %3011 = vmatprep.mubr.msk.f32.mxu0 %vm272_vm0, %v240_v8  ;;  %3090 = vmatpush3.msra.mxu0 %v668_v23  ;;  %v3668_v47 = vld [vmem:[%s3634_s8 + $0x40] sm:$0xff]  ;;  %v3673_v48 = vld [vmem:[%s3634_s8 + $0x48] sm:$0xff]  ;;  %v3676_v49 = vld [vmem:[%s3634_s8 + $0x50] sm:$0xff] }
  0x2a   : > { %v3681_v50 = vld [vmem:[%s3634_s8 + $0x58] sm:$0xff]  ;;  %v3684_v51 = vld [vmem:[%s3634_s8 + $0x60] sm:$0xff]  ;;  %v3689_v52 = vld [vmem:[%s3634_s8 + $0x68] sm:$0xff]  ;;  %3091 = vmatprep.subr.mxu0 %v667_v55 }
  0x2b   : > { %v3692_v53 = vld [vmem:[%s3634_s8 + $0x70] sm:$0xff]  ;;  %v3697_v54 = vld [vmem:[%s3634_s8 + $0x78] sm:$0xff]  ;;  %3092 = vmatpush3.msra.mxu0 %v667_v55 }
  0x2c   : > { %3012 = vmatmul.mubr.msk.f32.gmra.mxu0 %vm272_vm0, %v241_v9 }
  0x2d   : > { %3014 = vmatprep.mubr.msk.f32.mxu0 %vm272_vm0, %v242_v10 }
  0x30   : > { %3015 = vmatmul.mubr.msk.f32.gmra.mxu0 %vm272_vm0, %v243_v11 }
  0x31   : > { %3017 = vmatprep.mubr.msk.f32.mxu0 %vm272_vm0, %v244_v12 }
  0x34   : > { %3018 = vmatmul.mubr.msk.f32.gmra.mxu0 %vm272_vm0, %v245_v13 }
  0x35   : > { %3020 = vmatprep.mubr.msk.f32.mxu0 %vm272_vm0, %v246_v14 }
  0x38   : > { %3021 = vmatmul.mubr.msk.f32.gmra.mxu0 %vm272_vm0, %v247_v15 }
  0x39   : > { %3023 = vmatprep.mubr.msk.f32.mxu0 %vm272_vm0, %v248_v16 }
  0x3c   : > { %3024 = vmatmul.mubr.msk.f32.gmra.mxu0 %vm272_vm0, %v249_v17 }
  0x3d   : > { %3026 = vmatprep.mubr.msk.f32.mxu0 %vm272_vm0, %v250_v18 }
  0x40   : > { %3027 = vmatmul.mubr.msk.f32.gmra.mxu0 %vm272_vm0, %v251_v19 }
  0xe4   : > { %v3007_v24 = vpop.f32.mrf.mxu0 }
  0xe6   : > { %v387_v25 = vpop.f32.mrf.mxu0 }
  0xe8   : > { %v3010_v26 = vpop.f32.mrf.mxu0 }
  0xea   : > { %v397_v27 = vpop.f32.mrf.mxu0 }
  0xec   : > { %v3013_v28 = vpop.f32.mrf.mxu0 }
  0xee   : > { %v407_v29 = vpop.f32.mrf.mxu0 }
  0xf0   : > { %v3016_v30 = vpop.f32.mrf.mxu0 }
  0xf2   : > { %v417_v31 = vpop.f32.mrf.mxu0 }
  0xf4   : > { %v3019_v32 = vpop.f32.mrf.mxu0 }
  0xf6   : > { %v427_v33 = vpop.f32.mrf.mxu0 }
  0xf8   : > { %v3022_v34 = vpop.f32.mrf.mxu0 }
  0xfa   : > { %v437_v35 = vpop.f32.mrf.mxu0 }
  0xfc   : > { %v3025_v36 = vpop.f32.mrf.mxu0 }
  0xfe   : > { %v447_v37 = vpop.f32.mrf.mxu0 }
 0x100   : > { %v3028_v38 = vpop.f32.mrf.mxu0 }
 0x101   : > { %3029 = vmatprep.subr.mxu1 %v3028_v38 }
 0x102   : > { %v457_v39 = vpop.f32.mrf.mxu0  ;;  %3030 = vmatpush3.msra.mxu1 %v3028_v38 }
 0x103   : > { %3031 = vmatprep.subr.mxu1 %v457_v39 }
 0x104   : > { %3032 = vmatpush3.msra.mxu1 %v457_v39 }
 0x105   : > { %3033 = vmatprep.subr.mxu1 %v3025_v36 }
 0x106   : > { %3034 = vmatpush3.msra.mxu1 %v3025_v36 }
 0x107   : > { %3035 = vmatprep.subr.mxu1 %v447_v37 }
 0x108   : > { %3036 = vmatpush3.msra.mxu1 %v447_v37 }
 0x109   : > { %3037 = vmatprep.subr.mxu1 %v3022_v34 }
 0x10a   : > { %3038 = vmatpush3.msra.mxu1 %v3022_v34 }
 0x10b   : > { %3039 = vmatprep.subr.mxu1 %v437_v35 }
 0x10c   : > { %3040 = vmatpush3.msra.mxu1 %v437_v35 }
 0x10d   : > { %3041 = vmatprep.subr.mxu1 %v3019_v32 }
 0x10e   : > { %3042 = vmatpush3.msra.mxu1 %v3019_v32 }
 0x10f   : > { %3043 = vmatprep.subr.mxu1 %v427_v33 }
 0x110   : > { %3044 = vmatpush3.msra.mxu1 %v427_v33 }
 0x111   : > { %3045 = vmatprep.subr.mxu1 %v3016_v30 }
 0x112   : > { %3046 = vmatpush3.msra.mxu1 %v3016_v30 }
 0x113   : > { %3047 = vmatprep.subr.mxu1 %v417_v31 }
 0x114   : > { %3048 = vmatpush3.msra.mxu1 %v417_v31 }
 0x115   : > { %3049 = vmatprep.subr.mxu1 %v3013_v28 }
 0x116   : > { %3050 = vmatpush3.msra.mxu1 %v3013_v28 }
 0x117   : > { %3051 = vmatprep.subr.mxu1 %v407_v29 }
 0x118   : > { %3052 = vmatpush3.msra.mxu1 %v407_v29 }
 0x119   : > { %3053 = vmatprep.subr.mxu1 %v3010_v26 }
 0x11a   : > { %3054 = vmatpush3.msra.mxu1 %v3010_v26 }
 0x11b   : > { %3055 = vmatprep.subr.mxu1 %v397_v27 }
 0x11c   : > { %3056 = vmatpush3.msra.mxu1 %v397_v27 }
 0x11d   : > { %3057 = vmatprep.subr.mxu1 %v3007_v24 }
 0x11e   : > { %3058 = vmatpush3.msra.mxu1 %v3007_v24 }
 0x11f   : > { %3059 = vmatprep.subr.mxu1 %v387_v25 }
 0x120   : > { %3060 = vmatpush3.msra.mxu1 %v387_v25 }
 0x121   : > { %3062 = vmatmul.mubr.f32.vlgmr.msra.gmra.mxu1 %v3641_v40 }
 0x122   : > { %3064 = vmatprep.mubr.f32.mxu1 %v3644_v41 }
 0x125   : > { %3065 = vmatmul.mubr.f32.gmra.mxu1 %v3649_v42 }
 0x126   : > { %3067 = vmatprep.mubr.f32.mxu1 %v3652_v43 }
 0x129   : > { %3068 = vmatmul.mubr.f32.gmra.mxu1 %v3657_v44 }
 0x12a   : > { %3070 = vmatprep.mubr.f32.mxu1 %v3660_v45 }
 0x12d   : > { %3071 = vmatmul.mubr.f32.gmra.mxu1 %v3665_v46 }
 0x12e   : > { %3073 = vmatprep.mubr.f32.mxu1 %v3668_v47 }
 0x131   : > { %3074 = vmatmul.mubr.f32.gmra.mxu1 %v3673_v48 }
 0x132   : > { %3076 = vmatprep.mubr.f32.mxu1 %v3676_v49 }
 0x135   : > { %3077 = vmatmul.mubr.f32.gmra.mxu1 %v3681_v50 }
 0x136   : > { %3079 = vmatprep.mubr.f32.mxu1 %v3684_v51 }
 0x139   : > { %3080 = vmatmul.mubr.f32.gmra.mxu1 %v3689_v52 }
 0x13a   : > { %3082 = vmatprep.mubr.f32.mxu1 %v3692_v53 }
 0x13d   : > { %3083 = vmatmul.mubr.f32.gmra.mxu1 %v3697_v54 }
 0x13e   : > { %3149 = vmatprep.mubr.f32.mxu1 %v3637_v20 }
 0x1e1   : > { %v3063_v57 = vpop.f32.mrf.mxu1 }
 0x1e2   : > { %v545_v58 = vadd.f32 %v3063_v57, %v3704_v56 }
 0x1e3   : > { %v539_v59 = vpop.f32.mrf.mxu1 }
 0x1e4   : > { %v540_v60 = vadd.f32 %v3704_v56, %v539_v59  ;;  %v635_v61 = vmul.f32 0.01, %v545_v58  ;;  %vm619_vm1 = vcmp.gt.f32.partialorder %v545_v58, 0.0 }
 0x1e5   : > { %v3066_v62 = vpop.f32.mrf.mxu1 }
 0x1e6   : > { %vm618_vm2 = vcmp.gt.f32.partialorder %v540_v60, 0.0  ;;  %v634_v63 = vmul.f32 0.01, %v540_v60  ;;  %v555_v0 = vadd.f32 %v3066_v62, %v3704_v56  ;;  %v651_v4 = vsel %vm619_vm1, %v545_v58, %v635_v61 }
 0x1e7   : > { %v549_v1 = vpop.f32.mrf.mxu1 }
 0x1e8   : > { %v550_v2 = vadd.f32 %v3704_v56, %v549_v1  ;;  %v650_v3 = vsel %vm618_vm2, %v540_v60, %v634_v63  ;;  %v637_v5 = vmul.f32 0.01, %v555_v0  ;;  %vm621_vm3 = vcmp.gt.f32.partialorder %v555_v0, 0.0 }
 0x1e9   : > { %v3069_v6 = vpop.f32.mrf.mxu1  ;;  %3093 = vmatprep.mubr.msk.f32.mxu0 %vm272_vm0, %v650_v3 }
 0x1ea   : > { %vm620_vm4 = vcmp.gt.f32.partialorder %v550_v2, 0.0  ;;  %v636_v7 = vmul.f32 0.01, %v550_v2  ;;  %v565_v8 = vadd.f32 %v3069_v6, %v3704_v56  ;;  %3094 = vmatmul.mubr.msk.f32.vlgmr.msra.gmra.mxu0 %vm272_vm0, %v651_v4  ;;  %v653_v14 = vsel %vm621_vm3, %v555_v0, %v637_v5 }
 0x1eb   : > { %v559_v9 = vpop.f32.mrf.mxu1 }
 0x1ec   : > { %v560_v10 = vadd.f32 %v3704_v56, %v559_v9  ;;  %v652_v11 = vsel %vm620_vm4, %v550_v2, %v636_v7  ;;  %v639_v12 = vmul.f32 0.01, %v565_v8  ;;  %vm623_vm5 = vcmp.gt.f32.partialorder %v565_v8, 0.0 }
 0x1ed   : > { %v3072_v13 = vpop.f32.mrf.mxu1  ;;  %3096 = vmatprep.mubr.msk.f32.mxu0 %vm272_vm0, %v652_v11  ;;  %v1068_v11 = vld [vmem:[#allocation2 + $0x50] sm:$0xff] }
 0x1ee   : > { %vm622_vm6 = vcmp.gt.f32.partialorder %v560_v10, 0.0  ;;  %v638_v15 = vmul.f32 0.01, %v560_v10  ;;  %v575_v16 = vadd.f32 %v3072_v13, %v3704_v56  ;;  %3097 = vmatmul.mubr.msk.f32.gmra.mxu0 %vm272_vm0, %v653_v14  ;;  %v655_v23 = vsel %vm623_vm5, %v565_v8, %v639_v12 }
 0x1ef   : > { %v569_v17 = vpop.f32.mrf.mxu1 }
 0x1f0   : > { %v570_v18 = vadd.f32 %v3704_v56, %v569_v17  ;;  %v654_v19 = vsel %vm622_vm6, %v560_v10, %v638_v15  ;;  %v641_v21 = vmul.f32 0.01, %v575_v16  ;;  %vm625_vm7 = vcmp.gt.f32.partialorder %v575_v16, 0.0  ;;  %v1069_v10 = vld [vmem:[#allocation2 + $0x58] sm:$0xff] }
 0x1f1   : > { %v3075_v22 = vpop.f32.mrf.mxu1  ;;  %3099 = vmatprep.mubr.msk.f32.mxu0 %vm272_vm0, %v654_v19  ;;  %3173 = vmatprep.subr.mxu0 %v1069_v10 }
 0x1f2   : > { %vm624_vm8 = vcmp.gt.f32.partialorder %v570_v18, 0.0  ;;  %v640_v24 = vmul.f32 0.01, %v570_v18  ;;  %v585_v25 = vadd.f32 %v3075_v22, %v3704_v56  ;;  %3100 = vmatmul.mubr.msk.f32.gmra.mxu0 %vm272_vm0, %v655_v23  ;;  %v657_v31 = vsel %vm625_vm7, %v575_v16, %v641_v21 }
 0x1f3   : > { %v579_v26 = vpop.f32.mrf.mxu1  ;;  %3174 = vmatpush3.msra.mxu0 %v1069_v10 }
 0x1f4   : > { %v580_v27 = vadd.f32 %v3704_v56, %v579_v26  ;;  %v656_v28 = vsel %vm624_vm8, %v570_v18, %v640_v24  ;;  %v643_v29 = vmul.f32 0.01, %v585_v25  ;;  %vm627_vm9 = vcmp.gt.f32.partialorder %v585_v25, 0.0  ;;  %3175 = vmatprep.subr.mxu0 %v1068_v11 }
 0x1f5   : > { %v3078_v30 = vpop.f32.mrf.mxu1  ;;  %3102 = vmatprep.mubr.msk.f32.mxu0 %vm272_vm0, %v656_v28  ;;  %3176 = vmatpush3.msra.mxu0 %v1068_v11 }
 0x1f6   : > { %vm626_vm10 = vcmp.gt.f32.partialorder %v580_v27, 0.0  ;;  %v642_v32 = vmul.f32 0.01, %v580_v27  ;;  %v595_v33 = vadd.f32 %v3078_v30, %v3704_v56  ;;  %3103 = vmatmul.mubr.msk.f32.gmra.mxu0 %vm272_vm0, %v657_v31  ;;  %v659_v39 = vsel %vm627_vm9, %v585_v25, %v643_v29  ;;  %v1066_v29 = vld [vmem:[#allocation2 + $0x40] sm:$0xff] }
 0x1f7   : > { %v589_v34 = vpop.f32.mrf.mxu1  ;;  %v3757_v30 = vld [vmem:[%s3959_s3 + $0x1] ss:$0 sm:$0xff] }
 0x1f8   : > { %v590_v35 = vadd.f32 %v3704_v56, %v589_v34  ;;  %v658_v36 = vsel %vm626_vm10, %v580_v27, %v642_v32  ;;  %v645_v37 = vmul.f32 0.01, %v595_v33  ;;  %vm629_vm11 = vcmp.gt.f32.partialorder %v595_v33, 0.0 }
 0x1f9   : > { %v3081_v38 = vpop.f32.mrf.mxu1  ;;  %3105 = vmatprep.mubr.msk.f32.mxu0 %vm272_vm0, %v658_v36 }
 0x1fa   : > { %vm628_vm12 = vcmp.gt.f32.partialorder %v590_v35, 0.0  ;;  %v644_v55 = vmul.f32 0.01, %v590_v35  ;;  %v605_v57 = vadd.f32 %v3081_v38, %v3704_v56  ;;  %3106 = vmatmul.mubr.msk.f32.gmra.mxu0 %vm272_vm0, %v659_v39  ;;  %v661_v63 = vsel %vm629_vm11, %v595_v33, %v645_v37 }
 0x1fb   : > { %v599_v58 = vpop.f32.mrf.mxu1 }
 0x1fc   : > { %v600_v59 = vadd.f32 %v3704_v56, %v599_v58  ;;  %v660_v60 = vsel %vm628_vm12, %v590_v35, %v644_v55  ;;  %v647_v61 = vmul.f32 0.01, %v605_v57  ;;  %vm631_vm13 = vcmp.gt.f32.partialorder %v605_v57, 0.0 }
 0x1fd   : > { %v3084_v62 = vpop.f32.mrf.mxu1  ;;  %3108 = vmatprep.mubr.msk.f32.mxu0 %vm272_vm0, %v660_v60 }
 0x1fe   : > { %vm630_vm14 = vcmp.gt.f32.partialorder %v600_v59, 0.0  ;;  %v646_v0 = vmul.f32 0.01, %v600_v59  ;;  %v615_v1 = vadd.f32 %v3084_v62, %v3704_v56  ;;  %3109 = vmatmul.mubr.msk.f32.gmra.mxu0 %vm272_vm0, %v661_v63  ;;  %v663_v6 = vsel %vm631_vm13, %v605_v57, %v647_v61 }
 0x1ff   : > { %v609_v2 = vpop.f32.mrf.mxu1 }
 0x200   : > { %v610_v3 = vadd.f32 %v3704_v56, %v609_v2  ;;  %v662_v4 = vsel %vm630_vm14, %v600_v59, %v646_v0  ;;  %v649_v5 = vmul.f32 0.01, %v615_v1  ;;  %vm633_vm15 = vcmp.gt.f32.partialorder %v615_v1, 0.0  ;;  %v1067_v56 = vld [vmem:[#allocation2 + $0x48] sm:$0xff] }
 0x201   : > { %3111 = vmatprep.mubr.msk.f32.mxu0 %vm272_vm0, %v662_v4  ;;  %3177 = vmatprep.subr.mxu0 %v1067_v56 }
 0x202   : > { %vm632_vm1 = vcmp.gt.f32.partialorder %v610_v3, 0.0  ;;  %v648_v7 = vmul.f32 0.01, %v610_v3  ;;  %3112 = vmatmul.mubr.msk.f32.gmra.mxu0 %vm272_vm0, %v663_v6  ;;  %v665_v9 = vsel %vm633_vm15, %v615_v1, %v649_v5 }
 0x203   : > { %3178 = vmatpush3.msra.mxu0 %v1067_v56 }
 0x204   : > { %v664_v8 = vsel %vm632_vm1, %v610_v3, %v648_v7  ;;  %3179 = vmatprep.subr.mxu0 %v1066_v29 }
 0x205   : > { %3114 = vmatprep.mubr.msk.f32.mxu0 %vm272_vm0, %v664_v8  ;;  %3180 = vmatpush3.msra.mxu0 %v1066_v29 }
 0x206   : > { %3115 = vmatmul.mubr.msk.f32.gmra.mxu0 %vm272_vm0, %v665_v9 }
 0x2aa   : > { %v3095_v12 = vpop.f32.mrf.mxu0 }
 0x2ac   : > { %v785_v13 = vpop.f32.mrf.mxu0 }
 0x2ae   : > { %v3098_v14 = vpop.f32.mrf.mxu0 }
 0x2b0   : > { %v795_v15 = vpop.f32.mrf.mxu0 }
 0x2b2   : > { %v3101_v16 = vpop.f32.mrf.mxu0 }
 0x2b4   : > { %v805_v17 = vpop.f32.mrf.mxu0 }
 0x2b6   : > { %v3104_v18 = vpop.f32.mrf.mxu0 }
 0x2b8   : > { %v815_v19 = vpop.f32.mrf.mxu0 }
 0x2ba   : > { %v3107_v21 = vpop.f32.mrf.mxu0 }
 0x2bc   : > { %v825_v22 = vpop.f32.mrf.mxu0 }
 0x2be   : > { %v3110_v23 = vpop.f32.mrf.mxu0 }
 0x2c0   : > { %v835_v24 = vpop.f32.mrf.mxu0 }
 0x2c2   : > { %v3113_v25 = vpop.f32.mrf.mxu0 }
 0x2c4   : > { %v845_v26 = vpop.f32.mrf.mxu0 }
 0x2c6   : > { %v3116_v27 = vpop.f32.mrf.mxu0 }
 0x2c7   : > { %3117 = vmatprep.subr.mxu1 %v3116_v27 }
 0x2c8   : > { %v855_v28 = vpop.f32.mrf.mxu0  ;;  %3118 = vmatpush3.msra.mxu1 %v3116_v27 }
 0x2c9   : > { %3119 = vmatprep.subr.mxu1 %v855_v28 }
 0x2ca   : > { %3120 = vmatpush3.msra.mxu1 %v855_v28 }
 0x2cb   : > { %3121 = vmatprep.subr.mxu1 %v3113_v25 }
 0x2cc   : > { %3122 = vmatpush3.msra.mxu1 %v3113_v25 }
 0x2cd   : > { %3123 = vmatprep.subr.mxu1 %v845_v26 }
 0x2ce   : > { %3124 = vmatpush3.msra.mxu1 %v845_v26 }
 0x2cf   : > { %3125 = vmatprep.subr.mxu1 %v3110_v23 }
 0x2d0   : > { %3126 = vmatpush3.msra.mxu1 %v3110_v23 }
 0x2d1   : > { %3127 = vmatprep.subr.mxu1 %v835_v24 }
 0x2d2   : > { %3128 = vmatpush3.msra.mxu1 %v835_v24 }
 0x2d3   : > { %3129 = vmatprep.subr.mxu1 %v3107_v21 }
 0x2d4   : > { %3130 = vmatpush3.msra.mxu1 %v3107_v21 }
 0x2d5   : > { %3131 = vmatprep.subr.mxu1 %v825_v22 }
 0x2d6   : > { %3132 = vmatpush3.msra.mxu1 %v825_v22 }
 0x2d7   : > { %3133 = vmatprep.subr.mxu1 %v3104_v18 }
 0x2d8   : > { %3134 = vmatpush3.msra.mxu1 %v3104_v18 }
 0x2d9   : > { %3135 = vmatprep.subr.mxu1 %v815_v19 }
 0x2da   : > { %3136 = vmatpush3.msra.mxu1 %v815_v19 }
 0x2db   : > { %3137 = vmatprep.subr.mxu1 %v3101_v16 }
 0x2dc   : > { %3138 = vmatpush3.msra.mxu1 %v3101_v16 }
 0x2dd   : > { %3139 = vmatprep.subr.mxu1 %v805_v17 }
 0x2de   : > { %3140 = vmatpush3.msra.mxu1 %v805_v17 }
 0x2df   : > { %3141 = vmatprep.subr.mxu1 %v3098_v14 }
 0x2e0   : > { %3142 = vmatpush3.msra.mxu1 %v3098_v14 }
 0x2e1   : > { %3143 = vmatprep.subr.mxu1 %v795_v15 }
 0x2e2   : > { %3144 = vmatpush3.msra.mxu1 %v795_v15 }
 0x2e3   : > { %3145 = vmatprep.subr.mxu1 %v3095_v12 }
 0x2e4   : > { %3146 = vmatpush3.msra.mxu1 %v3095_v12 }
 0x2e5   : > { %3147 = vmatprep.subr.mxu1 %v785_v13 }
 0x2e6   : > { %3148 = vmatpush3.msra.mxu1 %v785_v13 }
 0x2e7   : > { %3150 = vmatmul.mubr.f32.vlgmr.msra.gmra.mxu1 %v3641_v40 }
 0x2e8   : > { %3152 = vmatprep.mubr.f32.mxu1 %v3644_v41 }
 0x2eb   : > { %3153 = vmatmul.mubr.f32.gmra.mxu1 %v3649_v42 }
 0x2ec   : > { %3155 = vmatprep.mubr.f32.mxu1 %v3652_v43 }
 0x2ef   : > { %3156 = vmatmul.mubr.f32.gmra.mxu1 %v3657_v44 }
 0x2f0   : > { %3158 = vmatprep.mubr.f32.mxu1 %v3660_v45 }
 0x2f3   : > { %3159 = vmatmul.mubr.f32.gmra.mxu1 %v3665_v46 }
 0x2f4   : > { %3161 = vmatprep.mubr.f32.mxu1 %v3668_v47 }
 0x2f7   : > { %3162 = vmatmul.mubr.f32.gmra.mxu1 %v3673_v48 }
 0x2f8   : > { %3164 = vmatprep.mubr.f32.mxu1 %v3676_v49 }
 0x2fb   : > { %3165 = vmatmul.mubr.f32.gmra.mxu1 %v3681_v50 }
 0x2fc   : > { %3167 = vmatprep.mubr.f32.mxu1 %v3684_v51 }
 0x2ff   : > { %3168 = vmatmul.mubr.f32.gmra.mxu1 %v3689_v52 }
 0x300   : > { %3170 = vmatprep.mubr.f32.mxu1 %v3692_v53 }
 0x303   : > { %3171 = vmatmul.mubr.f32.gmra.mxu1 %v3697_v54 }
 0x304   : > { %3237 = vmatprep.mubr.f32.mxu1 %v3637_v20 }
 0x3a7   : > { %v3151_v31 = vpop.f32.mrf.mxu1 }
 0x3a8   : > { %v944_v32 = vadd.f32 %v3151_v31, %v3757_v30 }
 0x3a9   : > { %v938_v33 = vpop.f32.mrf.mxu1 }
 0x3aa   : > { %v939_v34 = vadd.f32 %v3757_v30, %v938_v33  ;;  %v1034_v35 = vmul.f32 0.01, %v944_v32  ;;  %vm1018_vm2 = vcmp.gt.f32.partialorder %v944_v32, 0.0 }
 0x3ab   : > { %v3154_v36 = vpop.f32.mrf.mxu1 }
 0x3ac   : > { %vm1017_vm3 = vcmp.gt.f32.partialorder %v939_v34, 0.0  ;;  %v1033_v37 = vmul.f32 0.01, %v939_v34  ;;  %v954_v38 = vadd.f32 %v3154_v36, %v3757_v30  ;;  %v1050_v58 = vsel %vm1018_vm2, %v944_v32, %v1034_v35 }
 0x3ad   : > { %v948_v39 = vpop.f32.mrf.mxu1 }
 0x3ae   : > { %v949_v55 = vadd.f32 %v3757_v30, %v948_v39  ;;  %v1049_v57 = vsel %vm1017_vm3, %v939_v34, %v1033_v37  ;;  %v1036_v59 = vmul.f32 0.01, %v954_v38  ;;  %vm1020_vm4 = vcmp.gt.f32.partialorder %v954_v38, 0.0 }
 0x3af   : > { %v3157_v60 = vpop.f32.mrf.mxu1  ;;  %3181 = vmatprep.mubr.msk.f32.mxu0 %vm272_vm0, %v1049_v57 }
 0x3b0   : > { %vm1019_vm5 = vcmp.gt.f32.partialorder %v949_v55, 0.0  ;;  %v1035_v61 = vmul.f32 0.01, %v949_v55  ;;  %v964_v62 = vadd.f32 %v3157_v60, %v3757_v30  ;;  %3182 = vmatmul.mubr.msk.f32.vlgmr.msra.gmra.mxu0 %vm272_vm0, %v1050_v58  ;;  %v1052_v4 = vsel %vm1020_vm4, %v954_v38, %v1036_v59 }
 0x3b1   : > { %v958_v63 = vpop.f32.mrf.mxu1 }
 0x3b2   : > { %v959_v0 = vadd.f32 %v3757_v30, %v958_v63  ;;  %v1051_v1 = vsel %vm1019_vm5, %v949_v55, %v1035_v61  ;;  %v1038_v2 = vmul.f32 0.01, %v964_v62  ;;  %vm1022_vm6 = vcmp.gt.f32.partialorder %v964_v62, 0.0 }
 0x3b3   : > { %v3160_v3 = vpop.f32.mrf.mxu1  ;;  %3184 = vmatprep.mubr.msk.f32.mxu0 %vm272_vm0, %v1051_v1  ;;  %v1467_v1 = vld [vmem:[#allocation2 + $0x70] sm:$0xff] }
 0x3b4   : > { %vm1021_vm7 = vcmp.gt.f32.partialorder %v959_v0, 0.0  ;;  %v1037_v5 = vmul.f32 0.01, %v959_v0  ;;  %v974_v6 = vadd.f32 %v3160_v3, %v3757_v30  ;;  %3185 = vmatmul.mubr.msk.f32.gmra.mxu0 %vm272_vm0, %v1052_v4  ;;  %v1054_v56 = vsel %vm1022_vm6, %v964_v62, %v1038_v2 }
 0x3b5   : > { %v968_v7 = vpop.f32.mrf.mxu1 }
 0x3b6   : > { %v969_v8 = vadd.f32 %v3757_v30, %v968_v7  ;;  %v1053_v9 = vsel %vm1021_vm7, %v959_v0, %v1037_v5  ;;  %v1040_v10 = vmul.f32 0.01, %v974_v6  ;;  %vm1024_vm8 = vcmp.gt.f32.partialorder %v974_v6, 0.0  ;;  %v1468_v0 = vld [vmem:[#allocation2 + $0x78] sm:$0xff] }
 0x3b7   : > { %v3163_v11 = vpop.f32.mrf.mxu1  ;;  %3187 = vmatprep.mubr.msk.f32.mxu0 %vm272_vm0, %v1053_v9  ;;  %3261 = vmatprep.subr.mxu0 %v1468_v0 }
 0x3b8   : > { %vm1023_vm9 = vcmp.gt.f32.partialorder %v969_v8, 0.0  ;;  %v1039_v12 = vmul.f32 0.01, %v969_v8  ;;  %v984_v13 = vadd.f32 %v3163_v11, %v3757_v30  ;;  %3188 = vmatmul.mubr.msk.f32.gmra.mxu0 %vm272_vm0, %v1054_v56  ;;  %v1056_v19 = vsel %vm1024_vm8, %v974_v6, %v1040_v10 }
 0x3b9   : > { %v978_v14 = vpop.f32.mrf.mxu1  ;;  %3262 = vmatpush3.msra.mxu0 %v1468_v0 }
 0x3ba   : > { %v979_v15 = vadd.f32 %v3757_v30, %v978_v14  ;;  %v1055_v16 = vsel %vm1023_vm9, %v969_v8, %v1039_v12  ;;  %v1042_v17 = vmul.f32 0.01, %v984_v13  ;;  %vm1026_vm10 = vcmp.gt.f32.partialorder %v984_v13, 0.0  ;;  %3263 = vmatprep.subr.mxu0 %v1467_v1 }
 0x3bb   : > { %v3166_v18 = vpop.f32.mrf.mxu1  ;;  %3190 = vmatprep.mubr.msk.f32.mxu0 %vm272_vm0, %v1055_v16  ;;  %3264 = vmatpush3.msra.mxu0 %v1467_v1 }
 0x3bc   : > { %vm1025_vm11 = vcmp.gt.f32.partialorder %v979_v15, 0.0  ;;  %v1041_v21 = vmul.f32 0.01, %v979_v15  ;;  %v994_v22 = vadd.f32 %v3166_v18, %v3757_v30  ;;  %3191 = vmatmul.mubr.msk.f32.gmra.mxu0 %vm272_vm0, %v1056_v19  ;;  %v1058_v28 = vsel %vm1026_vm10, %v984_v13, %v1042_v17 }
 0x3bd   : > { %v988_v23 = vpop.f32.mrf.mxu1 }
 0x3be   : > { %v989_v24 = vadd.f32 %v3757_v30, %v988_v23  ;;  %v1057_v25 = vsel %vm1025_vm11, %v979_v15, %v1041_v21  ;;  %v1044_v26 = vmul.f32 0.01, %v994_v22  ;;  %vm1028_vm12 = vcmp.gt.f32.partialorder %v994_v22, 0.0 }
 0x3bf   : > { %v3169_v27 = vpop.f32.mrf.mxu1  ;;  %3193 = vmatprep.mubr.msk.f32.mxu0 %vm272_vm0, %v1057_v25 }
 0x3c0   : > { %vm1027_vm13 = vcmp.gt.f32.partialorder %v989_v24, 0.0  ;;  %v1043_v29 = vmul.f32 0.01, %v989_v24  ;;  %v1004_v31 = vadd.f32 %v3169_v27, %v3757_v30  ;;  %3194 = vmatmul.mubr.msk.f32.gmra.mxu0 %vm272_vm0, %v1058_v28  ;;  %v1060_v37 = vsel %vm1028_vm12, %v994_v22, %v1044_v26 }
 0x3c1   : > { %v998_v32 = vpop.f32.mrf.mxu1 }
 0x3c2   : > { %v999_v33 = vadd.f32 %v3757_v30, %v998_v32  ;;  %v1059_v34 = vsel %vm1027_vm13, %v989_v24, %v1043_v29  ;;  %v1046_v35 = vmul.f32 0.01, %v1004_v31  ;;  %vm1030_vm14 = vcmp.gt.f32.partialorder %v1004_v31, 0.0 }
 0x3c3   : > { %v3172_v36 = vpop.f32.mrf.mxu1  ;;  %3196 = vmatprep.mubr.msk.f32.mxu0 %vm272_vm0, %v1059_v34 }
 0x3c4   : > { %vm1029_vm15 = vcmp.gt.f32.partialorder %v999_v33, 0.0  ;;  %v1045_v38 = vmul.f32 0.01, %v999_v33  ;;  %v1014_v39 = vadd.f32 %v3172_v36, %v3757_v30  ;;  %3197 = vmatmul.mubr.msk.f32.gmra.mxu0 %vm272_vm0, %v1060_v37  ;;  %v1062_v60 = vsel %vm1030_vm14, %v1004_v31, %v1046_v35 }
 0x3c5   : > { %v1008_v55 = vpop.f32.mrf.mxu1 }
 0x3c6   : > { %v1009_v57 = vadd.f32 %v3757_v30, %v1008_v55  ;;  %v1061_v58 = vsel %vm1029_vm15, %v999_v33, %v1045_v38  ;;  %v1048_v59 = vmul.f32 0.01, %v1014_v39  ;;  %vm1032_vm1 = vcmp.gt.f32.partialorder %v1014_v39, 0.0  ;;  %v1466_v30 = vld [vmem:[#allocation2 + $0x68] sm:$0xff] }
 0x3c7   : > { %3199 = vmatprep.mubr.msk.f32.mxu0 %vm272_vm0, %v1061_v58  ;;  %3265 = vmatprep.subr.mxu0 %v1466_v30 }
 0x3c8   : > { %vm1031_vm2 = vcmp.gt.f32.partialorder %v1009_v57, 0.0  ;;  %v1047_v61 = vmul.f32 0.01, %v1009_v57  ;;  %3200 = vmatmul.mubr.msk.f32.gmra.mxu0 %vm272_vm0, %v1062_v60  ;;  %v1064_v63 = vsel %vm1032_vm1, %v1014_v39, %v1048_v59 }
 0x3c9   : > { %3266 = vmatpush3.msra.mxu0 %v1466_v30 }
 0x3ca   : > { %v1063_v62 = vsel %vm1031_vm2, %v1009_v57, %v1047_v61 }
 0x3cb   : > { %3202 = vmatprep.mubr.msk.f32.mxu0 %vm272_vm0, %v1063_v62 }
 0x3cc   : > { %3203 = vmatmul.mubr.msk.f32.gmra.mxu0 %vm272_vm0, %v1064_v63 }
 0x470   : > { %v3183_v2 = vpop.f32.mrf.mxu0 }
 0x472   : > { %v1184_v3 = vpop.f32.mrf.mxu0 }
 0x474   : > { %v3186_v4 = vpop.f32.mrf.mxu0 }
 0x476   : > { %v1194_v5 = vpop.f32.mrf.mxu0 }
 0x478   : > { %v3189_v6 = vpop.f32.mrf.mxu0 }
 0x47a   : > { %v1204_v7 = vpop.f32.mrf.mxu0 }
 0x47c   : > { %v3192_v8 = vpop.f32.mrf.mxu0 }
 0x47e   : > { %v1214_v9 = vpop.f32.mrf.mxu0 }
 0x480   : > { %v3195_v10 = vpop.f32.mrf.mxu0 }
 0x482   : > { %v1224_v11 = vpop.f32.mrf.mxu0 }
 0x484   : > { %v3198_v56 = vpop.f32.mrf.mxu0 }
 0x486   : > { %v1234_v12 = vpop.f32.mrf.mxu0 }
 0x488   : > { %v3201_v13 = vpop.f32.mrf.mxu0 }
 0x48a   : > { %v1244_v14 = vpop.f32.mrf.mxu0 }
 0x48c   : > { %v3204_v15 = vpop.f32.mrf.mxu0 }
 0x48d   : > { %3205 = vmatprep.subr.mxu1 %v3204_v15 }
 0x48e   : > { %v1254_v16 = vpop.f32.mrf.mxu0  ;;  %3206 = vmatpush3.msra.mxu1 %v3204_v15 }
 0x48f   : > { %3207 = vmatprep.subr.mxu1 %v1254_v16 }
 0x490   : > { %3208 = vmatpush3.msra.mxu1 %v1254_v16 }
 0x491   : > { %3209 = vmatprep.subr.mxu1 %v3201_v13 }
 0x492   : > { %3210 = vmatpush3.msra.mxu1 %v3201_v13 }
 0x493   : > { %3211 = vmatprep.subr.mxu1 %v1244_v14 }
 0x494   : > { %3212 = vmatpush3.msra.mxu1 %v1244_v14 }
 0x495   : > { %3213 = vmatprep.subr.mxu1 %v3198_v56 }
 0x496   : > { %3214 = vmatpush3.msra.mxu1 %v3198_v56 }
 0x497   : > { %3215 = vmatprep.subr.mxu1 %v1234_v12 }
 0x498   : > { %3216 = vmatpush3.msra.mxu1 %v1234_v12 }
 0x499   : > { %3217 = vmatprep.subr.mxu1 %v3195_v10 }
 0x49a   : > { %3218 = vmatpush3.msra.mxu1 %v3195_v10 }
 0x49b   : > { %3219 = vmatprep.subr.mxu1 %v1224_v11 }
 0x49c   : > { %3220 = vmatpush3.msra.mxu1 %v1224_v11 }
 0x49d   : > { %3221 = vmatprep.subr.mxu1 %v3192_v8 }
 0x49e   : > { %3222 = vmatpush3.msra.mxu1 %v3192_v8 }
 0x49f   : > { %3223 = vmatprep.subr.mxu1 %v1214_v9 }
 0x4a0   : > { %3224 = vmatpush3.msra.mxu1 %v1214_v9 }
 0x4a1   : > { %3225 = vmatprep.subr.mxu1 %v3189_v6 }
 0x4a2   : > { %3226 = vmatpush3.msra.mxu1 %v3189_v6 }
 0x4a3   : > { %3227 = vmatprep.subr.mxu1 %v1204_v7 }
 0x4a4   : > { %3228 = vmatpush3.msra.mxu1 %v1204_v7 }
 0x4a5   : > { %3229 = vmatprep.subr.mxu1 %v3186_v4 }
 0x4a6   : > { %3230 = vmatpush3.msra.mxu1 %v3186_v4 }
 0x4a7   : > { %3231 = vmatprep.subr.mxu1 %v1194_v5 }
 0x4a8   : > { %3232 = vmatpush3.msra.mxu1 %v1194_v5 }
 0x4a9   : > { %3233 = vmatprep.subr.mxu1 %v3183_v2 }
 0x4aa   : > { %3234 = vmatpush3.msra.mxu1 %v3183_v2 }
 0x4ab   : > { %3235 = vmatprep.subr.mxu1 %v1184_v3 }
 0x4ac   : > { %3236 = vmatpush3.msra.mxu1 %v1184_v3 }
 0x4ad   : > { %3238 = vmatmul.mubr.f32.vlgmr.msra.gmra.mxu1 %v3641_v40  ;;  %v1465_v40 = vld [vmem:[#allocation2 + $0x60] sm:$0xff] }
 0x4ae   : > { %3240 = vmatprep.mubr.f32.mxu1 %v3644_v41  ;;  %3267 = vmatprep.subr.mxu0 %v1465_v40  ;;  %v3810_v41 = vld [vmem:[%s3959_s3 + $0x2] ss:$0 sm:$0xff] }
 0x4af   : > { %3268 = vmatpush3.msra.mxu0 %v1465_v40 }
 0x4b1   : > { %3241 = vmatmul.mubr.f32.gmra.mxu1 %v3649_v42 }
 0x4b2   : > { %3243 = vmatprep.mubr.f32.mxu1 %v3652_v43 }
 0x4b5   : > { %3244 = vmatmul.mubr.f32.gmra.mxu1 %v3657_v44 }
 0x4b6   : > { %3246 = vmatprep.mubr.f32.mxu1 %v3660_v45 }
 0x4b9   : > { %3247 = vmatmul.mubr.f32.gmra.mxu1 %v3665_v46 }
 0x4ba   : > { %3249 = vmatprep.mubr.f32.mxu1 %v3668_v47 }
 0x4bd   : > { %3250 = vmatmul.mubr.f32.gmra.mxu1 %v3673_v48 }
 0x4be   : > { %3252 = vmatprep.mubr.f32.mxu1 %v3676_v49 }
 0x4c1   : > { %3253 = vmatmul.mubr.f32.gmra.mxu1 %v3681_v50 }
 0x4c2   : > { %3255 = vmatprep.mubr.f32.mxu1 %v3684_v51 }
 0x4c5   : > { %3256 = vmatmul.mubr.f32.gmra.mxu1 %v3689_v52 }
 0x4c6   : > { %3258 = vmatprep.mubr.f32.mxu1 %v3692_v53 }
 0x4c9   : > { %3259 = vmatmul.mubr.f32.gmra.mxu1 %v3697_v54 }
 0x4ca   : > { %3325 = vmatprep.mubr.f32.mxu1 %v3637_v20 }
 0x56d   : > { %v3239_v42 = vpop.f32.mrf.mxu1 }
 0x56e   : > { %v1343_v43 = vadd.f32 %v3239_v42, %v3810_v41 }
 0x56f   : > { %v1337_v44 = vpop.f32.mrf.mxu1 }
 0x570   : > { %v1338_v45 = vadd.f32 %v3810_v41, %v1337_v44  ;;  %v1433_v46 = vmul.f32 0.01, %v1343_v43  ;;  %vm1417_vm3 = vcmp.gt.f32.partialorder %v1343_v43, 0.0  ;;  %v1866_v44 = vld [vmem:[#allocation2 + $0x90] sm:$0xff] }
 0x571   : > { %v3242_v47 = vpop.f32.mrf.mxu1 }
 0x572   : > { %vm1416_vm4 = vcmp.gt.f32.partialorder %v1338_v45, 0.0  ;;  %v1432_v48 = vmul.f32 0.01, %v1338_v45  ;;  %v1353_v20 = vadd.f32 %v3242_v47, %v3810_v41  ;;  %v1449_v52 = vsel %vm1417_vm3, %v1343_v43, %v1433_v46  ;;  %v1867_v43 = vld [vmem:[#allocation2 + $0x98] sm:$0xff] }
 0x573   : > { %v1347_v49 = vpop.f32.mrf.mxu1  ;;  %3349 = vmatprep.subr.mxu0 %v1867_v43 }
 0x574   : > { %v1348_v50 = vadd.f32 %v3810_v41, %v1347_v49  ;;  %v1448_v51 = vsel %vm1416_vm4, %v1338_v45, %v1432_v48  ;;  %v1435_v53 = vmul.f32 0.01, %v1353_v20  ;;  %vm1419_vm5 = vcmp.gt.f32.partialorder %v1353_v20, 0.0 }
 0x575   : > { %v3245_v54 = vpop.f32.mrf.mxu1  ;;  %3269 = vmatprep.mubr.msk.f32.mxu0 %vm272_vm0, %v1448_v51 }
 0x576   : > { %vm1418_vm6 = vcmp.gt.f32.partialorder %v1348_v50, 0.0  ;;  %v1434_v17 = vmul.f32 0.01, %v1348_v50  ;;  %v1363_v18 = vadd.f32 %v3245_v54, %v3810_v41  ;;  %3270 = vmatmul.mubr.msk.f32.vlgmr.msra.gmra.mxu0 %vm272_vm0, %v1449_v52  ;;  %v1451_v25 = vsel %vm1419_vm5, %v1353_v20, %v1435_v53 }
 0x577   : > { %v1357_v19 = vpop.f32.mrf.mxu1  ;;  %3350 = vmatpush3.msra.mxu0 %v1867_v43 }
 0x578   : > { %v1358_v21 = vadd.f32 %v3810_v41, %v1357_v19  ;;  %v1450_v22 = vsel %vm1418_vm6, %v1348_v50, %v1434_v17  ;;  %v1437_v23 = vmul.f32 0.01, %v1363_v18  ;;  %vm1421_vm7 = vcmp.gt.f32.partialorder %v1363_v18, 0.0  ;;  %3351 = vmatprep.subr.mxu0 %v1866_v44 }
 0x579   : > { %v3248_v24 = vpop.f32.mrf.mxu1  ;;  %3272 = vmatprep.mubr.msk.f32.mxu0 %vm272_vm0, %v1450_v22  ;;  %3352 = vmatpush3.msra.mxu0 %v1866_v44 }
 0x57a   : > { %vm1420_vm8 = vcmp.gt.f32.partialorder %v1358_v21, 0.0  ;;  %v1436_v26 = vmul.f32 0.01, %v1358_v21  ;;  %v1373_v27 = vadd.f32 %v3248_v24, %v3810_v41  ;;  %3273 = vmatmul.mubr.msk.f32.gmra.mxu0 %vm272_vm0, %v1451_v25  ;;  %v1453_v34 = vsel %vm1421_vm7, %v1363_v18, %v1437_v23  ;;  %v3481_v23 = vld [vmem:[%s3634_s8 + $0x8] sm:$0xff]  ;;  %v3482_v24 = vld [vmem:[%s3634_s8 + $0x10] sm:$0xff]  ;;  %v3483_v25 = vld [vmem:[%s3634_s8 + $0x18] sm:$0xff] }
 0x57b   : > { %v1367_v28 = vpop.f32.mrf.mxu1 }
 0x57c   : > { %v1368_v29 = vadd.f32 %v3810_v41, %v1367_v28  ;;  %v1452_v31 = vsel %vm1420_vm8, %v1358_v21, %v1436_v26  ;;  %v1439_v32 = vmul.f32 0.01, %v1373_v27  ;;  %vm1423_vm9 = vcmp.gt.f32.partialorder %v1373_v27, 0.0  ;;  %v3484_v26 = vld [vmem:[%s3634_s8 + $0x20] sm:$0xff]  ;;  %v3486_v28 = vld [vmem:[%s3634_s8 + $0x30] sm:$0xff] }
 0x57d   : > { %v3251_v33 = vpop.f32.mrf.mxu1  ;;  %3275 = vmatprep.mubr.msk.f32.mxu0 %vm272_vm0, %v1452_v31  ;;  %v3488_v31 = vld [vmem:[%s3634_s8 + $0x40] sm:$0xff] }
 0x57e   : > { %vm1422_vm10 = vcmp.gt.f32.partialorder %v1368_v29, 0.0  ;;  %v1438_v35 = vmul.f32 0.01, %v1368_v29  ;;  %v1383_v36 = vadd.f32 %v3251_v33, %v3810_v41  ;;  %3276 = vmatmul.mubr.msk.f32.gmra.mxu0 %vm272_vm0, %v1453_v34  ;;  %v1455_v58 = vsel %vm1423_vm9, %v1373_v27, %v1439_v32  ;;  %v3485_v27 = vld [vmem:[%s3634_s8 + $0x28] sm:$0xff]  ;;  %v3490_v33 = vld [vmem:[%s3634_s8 + $0x50] sm:$0xff]  ;;  %v3491_v34 = vld [vmem:[%s3634_s8 + $0x58] sm:$0xff] }
 0x57f   : > { %v1377_v37 = vpop.f32.mrf.mxu1  ;;  %v3489_v32 = vld [vmem:[%s3634_s8 + $0x48] sm:$0xff] }
 0x580   : > { %v1378_v38 = vadd.f32 %v3810_v41, %v1377_v37  ;;  %v1454_v39 = vsel %vm1422_vm10, %v1368_v29, %v1438_v35  ;;  %v1441_v55 = vmul.f32 0.01, %v1383_v36  ;;  %vm1425_vm11 = vcmp.gt.f32.partialorder %v1383_v36, 0.0  ;;  %v3487_v29 = vld [vmem:[%s3634_s8 + $0x38] sm:$0xff]  ;;  %v3492_v35 = vld [vmem:[%s3634_s8 + $0x60] sm:$0xff]  ;;  %v3494_v37 = vld [vmem:[%s3634_s8 + $0x70] sm:$0xff] }
 0x581   : > { %v3254_v57 = vpop.f32.mrf.mxu1  ;;  %3278 = vmatprep.mubr.msk.f32.mxu0 %vm272_vm0, %v1454_v39  ;;  %v1864_v39 = vld [vmem:[#allocation2 + $0x80] sm:$0xff] }
 0x582   : > { %vm1424_vm12 = vcmp.gt.f32.partialorder %v1378_v38, 0.0  ;;  %v1440_v59 = vmul.f32 0.01, %v1378_v38  ;;  %v1393_v60 = vadd.f32 %v3254_v57, %v3810_v41  ;;  %3279 = vmatmul.mubr.msk.f32.gmra.mxu0 %vm272_vm0, %v1455_v58  ;;  %v1457_v30 = vsel %vm1425_vm11, %v1383_v36, %v1441_v55  ;;  %v3493_v36 = vld [vmem:[%s3634_s8 + $0x68] sm:$0xff]  ;;  %v2121_v55 = vld [vmem:[#allocation2 + $0xb8] sm:$0xff]  ;;  %v2120_v57 = vld [vmem:[#allocation2 + $0xb0] sm:$0xff] }
 0x583   : > { %v1387_v61 = vpop.f32.mrf.mxu1  ;;  %v2119_v58 = vld [vmem:[#allocation2 + $0xa8] sm:$0xff] }
 0x584   : > { %v1388_v62 = vadd.f32 %v3810_v41, %v1387_v61  ;;  %v1456_v63 = vsel %vm1424_vm12, %v1378_v38, %v1440_v59  ;;  %v1443_v0 = vmul.f32 0.01, %v1393_v60  ;;  %vm1427_vm13 = vcmp.gt.f32.partialorder %v1393_v60, 0.0  ;;  %v3495_v38 = vld [vmem:[%s3634_s8 + $0x78] sm:$0xff]  ;;  %v3862_v59 = vld [vmem:[%s3959_s3 + $0x3] ss:$0 sm:$0xff] }
 0x585   : > { %v3257_v1 = vpop.f32.mrf.mxu1  ;;  %3281 = vmatprep.mubr.msk.f32.mxu0 %vm272_vm0, %v1456_v63 }
 0x586   : > { %vm1426_vm14 = vcmp.gt.f32.partialorder %v1388_v62, 0.0  ;;  %v1442_v2 = vmul.f32 0.01, %v1388_v62  ;;  %v1403_v3 = vadd.f32 %v3257_v1, %v3810_v41  ;;  %3282 = vmatmul.mubr.msk.f32.gmra.mxu0 %vm272_vm0, %v1457_v30  ;;  %v1459_v9 = vsel %vm1427_vm13, %v1393_v60, %v1443_v0 }
 0x587   : > { %v1397_v4 = vpop.f32.mrf.mxu1 }
 0x588   : > { %v1398_v5 = vadd.f32 %v3810_v41, %v1397_v4  ;;  %v1458_v6 = vsel %vm1426_vm14, %v1388_v62, %v1442_v2  ;;  %v1445_v7 = vmul.f32 0.01, %v1403_v3  ;;  %vm1429_vm15 = vcmp.gt.f32.partialorder %v1403_v3, 0.0 }
 0x589   : > { %v3260_v8 = vpop.f32.mrf.mxu1  ;;  %3284 = vmatprep.mubr.msk.f32.mxu0 %vm272_vm0, %v1458_v6 }
 0x58a   : > { %vm1428_vm1 = vcmp.gt.f32.partialorder %v1398_v5, 0.0  ;;  %v1444_v10 = vmul.f32 0.01, %v1398_v5  ;;  %v1413_v11 = vadd.f32 %v3260_v8, %v3810_v41  ;;  %3285 = vmatmul.mubr.msk.f32.gmra.mxu0 %vm272_vm0, %v1459_v9  ;;  %v1461_v15 = vsel %vm1429_vm15, %v1403_v3, %v1445_v7 }
 0x58b   : > { %v1407_v56 = vpop.f32.mrf.mxu1 }
 0x58c   : > { %v1408_v12 = vadd.f32 %v3810_v41, %v1407_v56  ;;  %v1460_v13 = vsel %vm1428_vm1, %v1398_v5, %v1444_v10  ;;  %v1447_v14 = vmul.f32 0.01, %v1413_v11  ;;  %vm1431_vm2 = vcmp.gt.f32.partialorder %v1413_v11, 0.0  ;;  %v1865_v41 = vld [vmem:[#allocation2 + $0x88] sm:$0xff] }
 0x58d   : > { %3287 = vmatprep.mubr.msk.f32.mxu0 %vm272_vm0, %v1460_v13  ;;  %3353 = vmatprep.subr.mxu0 %v1865_v41 }
 0x58e   : > { %vm1430_vm3 = vcmp.gt.f32.partialorder %v1408_v12, 0.0  ;;  %v1446_v16 = vmul.f32 0.01, %v1408_v12  ;;  %3288 = vmatmul.mubr.msk.f32.gmra.mxu0 %vm272_vm0, %v1461_v15  ;;  %v1463_v42 = vsel %vm1431_vm2, %v1413_v11, %v1447_v14 }
 0x58f   : > { %3354 = vmatpush3.msra.mxu0 %v1865_v41 }
 0x590   : > { %v1462_v40 = vsel %vm1430_vm3, %v1408_v12, %v1446_v16  ;;  %3355 = vmatprep.subr.mxu0 %v1864_v39 }
 0x591   : > { %3290 = vmatprep.mubr.msk.f32.mxu0 %vm272_vm0, %v1462_v40  ;;  %3356 = vmatpush3.msra.mxu0 %v1864_v39 }
 0x592   : > { %3291 = vmatmul.mubr.msk.f32.gmra.mxu0 %vm272_vm0, %v1463_v42 }
 0x636   : > { %v3271_v45 = vpop.f32.mrf.mxu0 }
 0x638   : > { %v1583_v46 = vpop.f32.mrf.mxu0 }
 0x63a   : > { %v3274_v47 = vpop.f32.mrf.mxu0 }
 0x63c   : > { %v1593_v48 = vpop.f32.mrf.mxu0 }
 0x63e   : > { %v3277_v20 = vpop.f32.mrf.mxu0 }
 0x640   : > { %v1603_v49 = vpop.f32.mrf.mxu0 }
 0x642   : > { %v3280_v50 = vpop.f32.mrf.mxu0 }
 0x644   : > { %v1613_v51 = vpop.f32.mrf.mxu0 }
 0x646   : > { %v3283_v52 = vpop.f32.mrf.mxu0 }
 0x648   : > { %v1623_v53 = vpop.f32.mrf.mxu0 }
 0x64a   : > { %v3286_v54 = vpop.f32.mrf.mxu0 }
 0x64c   : > { %v1633_v17 = vpop.f32.mrf.mxu0 }
 0x64e   : > { %v3289_v18 = vpop.f32.mrf.mxu0 }
 0x650   : > { %v1643_v19 = vpop.f32.mrf.mxu0 }
 0x652   : > { %v3292_v21 = vpop.f32.mrf.mxu0 }
 0x653   : > { %3293 = vmatprep.subr.mxu1 %v3292_v21 }
 0x654   : > { %v1653_v22 = vpop.f32.mrf.mxu0  ;;  %3294 = vmatpush3.msra.mxu1 %v3292_v21 }
 0x655   : > { %3295 = vmatprep.subr.mxu1 %v1653_v22 }
 0x656   : > { %3296 = vmatpush3.msra.mxu1 %v1653_v22 }
 0x657   : > { %3297 = vmatprep.subr.mxu1 %v3289_v18 }
 0x658   : > { %3298 = vmatpush3.msra.mxu1 %v3289_v18 }
 0x659   : > { %3299 = vmatprep.subr.mxu1 %v1643_v19 }
 0x65a   : > { %3300 = vmatpush3.msra.mxu1 %v1643_v19 }
 0x65b   : > { %3301 = vmatprep.subr.mxu1 %v3286_v54 }
 0x65c   : > { %3302 = vmatpush3.msra.mxu1 %v3286_v54 }
 0x65d   : > { %3303 = vmatprep.subr.mxu1 %v1633_v17 }
 0x65e   : > { %3304 = vmatpush3.msra.mxu1 %v1633_v17 }
 0x65f   : > { %3305 = vmatprep.subr.mxu1 %v3283_v52 }
 0x660   : > { %3306 = vmatpush3.msra.mxu1 %v3283_v52 }
 0x661   : > { %3307 = vmatprep.subr.mxu1 %v1623_v53 }
 0x662   : > { %3308 = vmatpush3.msra.mxu1 %v1623_v53 }
 0x663   : > { %3309 = vmatprep.subr.mxu1 %v3280_v50 }
 0x664   : > { %3310 = vmatpush3.msra.mxu1 %v3280_v50 }
 0x665   : > { %3311 = vmatprep.subr.mxu1 %v1613_v51 }
 0x666   : > { %3312 = vmatpush3.msra.mxu1 %v1613_v51 }
 0x667   : > { %3313 = vmatprep.subr.mxu1 %v3277_v20 }
 0x668   : > { %3314 = vmatpush3.msra.mxu1 %v3277_v20 }
 0x669   : > { %3315 = vmatprep.subr.mxu1 %v1603_v49 }
 0x66a   : > { %3316 = vmatpush3.msra.mxu1 %v1603_v49 }
 0x66b   : > { %3317 = vmatprep.subr.mxu1 %v3274_v47 }
 0x66c   : > { %3318 = vmatpush3.msra.mxu1 %v3274_v47 }
 0x66d   : > { %3319 = vmatprep.subr.mxu1 %v1593_v48 }
 0x66e   : > { %3320 = vmatpush3.msra.mxu1 %v1593_v48 }
 0x66f   : > { %3321 = vmatprep.subr.mxu1 %v3271_v45 }
 0x670   : > { %3322 = vmatpush3.msra.mxu1 %v3271_v45 }
 0x671   : > { %3323 = vmatprep.subr.mxu1 %v1583_v46 }
 0x672   : > { %3324 = vmatpush3.msra.mxu1 %v1583_v46 }
 0x673   : > { %3326 = vmatmul.mubr.f32.vlgmr.msra.gmra.mxu1 %v3481_v23  ;;  %3381 = vmatprep.subr.mxu1 %v2121_v55 }
 0x674   : > { %3328 = vmatprep.mubr.f32.mxu1 %v3482_v24  ;;  %3382 = vmatpush3.msra.mxu1 %v2121_v55 }
 0x675   : > { %3383 = vmatprep.subr.mxu1 %v2120_v57 }
 0x676   : > { %3384 = vmatpush3.msra.mxu1 %v2120_v57 }
 0x677   : > { %3329 = vmatmul.mubr.f32.gmra.mxu1 %v3483_v25  ;;  %3385 = vmatprep.subr.mxu1 %v2119_v58 }
 0x678   : > { %3331 = vmatprep.mubr.f32.mxu1 %v3484_v26  ;;  %3386 = vmatpush3.msra.mxu1 %v2119_v58 }
 0x67b   : > { %3332 = vmatmul.mubr.f32.gmra.mxu1 %v3485_v27 }
 0x67c   : > { %3334 = vmatprep.mubr.f32.mxu1 %v3486_v28 }
 0x67f   : > { %3335 = vmatmul.mubr.f32.gmra.mxu1 %v3487_v29 }
 0x680   : > { %3337 = vmatprep.mubr.f32.mxu1 %v3488_v31 }
 0x683   : > { %3338 = vmatmul.mubr.f32.gmra.mxu1 %v3489_v32 }
 0x684   : > { %3340 = vmatprep.mubr.f32.mxu1 %v3490_v33 }
 0x687   : > { %3341 = vmatmul.mubr.f32.gmra.mxu1 %v3491_v34 }
 0x688   : > { %3343 = vmatprep.mubr.f32.mxu1 %v3492_v35 }
 0x68b   : > { %3344 = vmatmul.mubr.f32.gmra.mxu1 %v3493_v36 }
 0x68c   : > { %3346 = vmatprep.mubr.f32.mxu1 %v3494_v37 }
 0x68f   : > { %3347 = vmatmul.mubr.f32.gmra.mxu1 %v3495_v38 }
 0x733   : > { %v3327_v60 = vpop.f32.mrf.mxu1 }
 0x734   : > { %v1742_v61 = vadd.f32 %v3327_v60, %v3862_v59 }
 0x735   : > { %v1736_v62 = vpop.f32.mrf.mxu1 }
 0x736   : > { %v1737_v63 = vadd.f32 %v3862_v59, %v1736_v62  ;;  %v1832_v0 = vmul.f32 0.01, %v1742_v61  ;;  %vm1816_vm4 = vcmp.gt.f32.partialorder %v1742_v61, 0.0 }
 0x737   : > { %v3330_v1 = vpop.f32.mrf.mxu1 }
 0x738   : > { %vm1815_vm5 = vcmp.gt.f32.partialorder %v1737_v63, 0.0  ;;  %v1831_v30 = vmul.f32 0.01, %v1737_v63  ;;  %v1752_v2 = vadd.f32 %v3330_v1, %v3862_v59  ;;  %v1848_v6 = vsel %vm1816_vm4, %v1742_v61, %v1832_v0  ;;  %v2118_v61 = vld [vmem:[#allocation2 + $0xa0] sm:$0xff] }
 0x739   : > { %v1746_v3 = vpop.f32.mrf.mxu1  ;;  %3387 = vmatprep.subr.mxu1 %v2118_v61 }
 0x73a   : > { %v1747_v4 = vadd.f32 %v3862_v59, %v1746_v3  ;;  %v1847_v5 = vsel %vm1815_vm5, %v1737_v63, %v1831_v30  ;;  %v1834_v7 = vmul.f32 0.01, %v1752_v2  ;;  %vm1818_vm6 = vcmp.gt.f32.partialorder %v1752_v2, 0.0  ;;  %3388 = vmatpush3.msra.mxu1 %v2118_v61 }
 0x73b   : > { %v3333_v8 = vpop.f32.mrf.mxu1  ;;  %3357 = vmatprep.mubr.msk.f32.mxu0 %vm272_vm0, %v1847_v5 }
 0x73c   : > { %vm1817_vm7 = vcmp.gt.f32.partialorder %v1747_v4, 0.0  ;;  %v1833_v9 = vmul.f32 0.01, %v1747_v4  ;;  %v1762_v10 = vadd.f32 %v3333_v8, %v3862_v59  ;;  %3358 = vmatmul.mubr.msk.f32.vlgmr.msra.gmra.mxu0 %vm272_vm0, %v1848_v6  ;;  %v1850_v15 = vsel %vm1818_vm6, %v1752_v2, %v1834_v7 }
 0x73d   : > { %v1756_v11 = vpop.f32.mrf.mxu1 }
 0x73e   : > { %v1757_v56 = vadd.f32 %v3862_v59, %v1756_v11  ;;  %v1849_v12 = vsel %vm1817_vm7, %v1747_v4, %v1833_v9  ;;  %v1836_v13 = vmul.f32 0.01, %v1762_v10  ;;  %vm1820_vm8 = vcmp.gt.f32.partialorder %v1762_v10, 0.0 }
 0x73f   : > { %v3336_v14 = vpop.f32.mrf.mxu1  ;;  %3360 = vmatprep.mubr.msk.f32.mxu0 %vm272_vm0, %v1849_v12 }
 0x740   : > { %vm1819_vm9 = vcmp.gt.f32.partialorder %v1757_v56, 0.0  ;;  %v1835_v16 = vmul.f32 0.01, %v1757_v56  ;;  %v1772_v40 = vadd.f32 %v3336_v14, %v3862_v59  ;;  %3361 = vmatmul.mubr.msk.f32.gmra.mxu0 %vm272_vm0, %v1850_v15  ;;  %v1852_v46 = vsel %vm1820_vm8, %v1762_v10, %v1836_v13 }
 0x741   : > { %v1766_v42 = vpop.f32.mrf.mxu1 }
 0x742   : > { %v1767_v43 = vadd.f32 %v3862_v59, %v1766_v42  ;;  %v1851_v44 = vsel %vm1819_vm9, %v1757_v56, %v1835_v16  ;;  %v1838_v41 = vmul.f32 0.01, %v1772_v40  ;;  %vm1822_vm10 = vcmp.gt.f32.partialorder %v1772_v40, 0.0 }
 0x743   : > { %v3339_v45 = vpop.f32.mrf.mxu1  ;;  %3363 = vmatprep.mubr.msk.f32.mxu0 %vm272_vm0, %v1851_v44 }
 0x744   : > { %vm1821_vm11 = vcmp.gt.f32.partialorder %v1767_v43, 0.0  ;;  %v1837_v47 = vmul.f32 0.01, %v1767_v43  ;;  %v1782_v48 = vadd.f32 %v3339_v45, %v3862_v59  ;;  %3364 = vmatmul.mubr.msk.f32.gmra.mxu0 %vm272_vm0, %v1852_v46  ;;  %v1854_v53 = vsel %vm1822_vm10, %v1772_v40, %v1838_v41 }
 0x745   : > { %v1776_v20 = vpop.f32.mrf.mxu1 }
 0x746   : > { %v1777_v49 = vadd.f32 %v3862_v59, %v1776_v20  ;;  %v1853_v50 = vsel %vm1821_vm11, %v1767_v43, %v1837_v47  ;;  %v1840_v51 = vmul.f32 0.01, %v1782_v48  ;;  %vm1824_vm12 = vcmp.gt.f32.partialorder %v1782_v48, 0.0 }
 0x747   : > { %v3342_v52 = vpop.f32.mrf.mxu1  ;;  %3366 = vmatprep.mubr.msk.f32.mxu0 %vm272_vm0, %v1853_v50 }
 0x748   : > { %vm1823_vm13 = vcmp.gt.f32.partialorder %v1777_v49, 0.0  ;;  %v1839_v54 = vmul.f32 0.01, %v1777_v49  ;;  %v1792_v17 = vadd.f32 %v3342_v52, %v3862_v59  ;;  %3367 = vmatmul.mubr.msk.f32.gmra.mxu0 %vm272_vm0, %v1854_v53  ;;  %v1856_v24 = vsel %vm1824_vm12, %v1782_v48, %v1840_v51 }
 0x749   : > { %v1786_v18 = vpop.f32.mrf.mxu1 }
 0x74a   : > { %v1787_v19 = vadd.f32 %v3862_v59, %v1786_v18  ;;  %v1855_v21 = vsel %vm1823_vm13, %v1777_v49, %v1839_v54  ;;  %v1842_v22 = vmul.f32 0.01, %v1792_v17  ;;  %vm1826_vm14 = vcmp.gt.f32.partialorder %v1792_v17, 0.0 }
 0x74b   : > { %v3345_v23 = vpop.f32.mrf.mxu1  ;;  %3369 = vmatprep.mubr.msk.f32.mxu0 %vm272_vm0, %v1855_v21 }
 0x74c   : > { %vm1825_vm15 = vcmp.gt.f32.partialorder %v1787_v19, 0.0  ;;  %v1841_v25 = vmul.f32 0.01, %v1787_v19  ;;  %v1802_v26 = vadd.f32 %v3345_v23, %v3862_v59  ;;  %3370 = vmatmul.mubr.msk.f32.gmra.mxu0 %vm272_vm0, %v1856_v24  ;;  %v1858_v33 = vsel %vm1826_vm14, %v1792_v17, %v1842_v22 }
 0x74d   : > { %v1796_v27 = vpop.f32.mrf.mxu1 }
 0x74e   : > { %v1797_v28 = vadd.f32 %v3862_v59, %v1796_v27  ;;  %v1857_v29 = vsel %vm1825_vm15, %v1787_v19, %v1841_v25  ;;  %v1844_v31 = vmul.f32 0.01, %v1802_v26  ;;  %vm1828_vm1 = vcmp.gt.f32.partialorder %v1802_v26, 0.0 }
 0x74f   : > { %v3348_v32 = vpop.f32.mrf.mxu1  ;;  %3372 = vmatprep.mubr.msk.f32.mxu0 %vm272_vm0, %v1857_v29 }
 0x750   : > { %vm1827_vm2 = vcmp.gt.f32.partialorder %v1797_v28, 0.0  ;;  %v1843_v34 = vmul.f32 0.01, %v1797_v28  ;;  %v1812_v35 = vadd.f32 %v3348_v32, %v3862_v59  ;;  %3373 = vmatmul.mubr.msk.f32.gmra.mxu0 %vm272_vm0, %v1858_v33  ;;  %v1860_v55 = vsel %vm1828_vm1, %v1802_v26, %v1844_v31 }
 0x751   : > { %v1806_v36 = vpop.f32.mrf.mxu1 }
 0x752   : > { %v1807_v37 = vadd.f32 %v3862_v59, %v1806_v36  ;;  %v1859_v38 = vsel %vm1827_vm2, %v1797_v28, %v1843_v34  ;;  %v1846_v39 = vmul.f32 0.01, %v1812_v35  ;;  %vm1830_vm3 = vcmp.gt.f32.partialorder %v1812_v35, 0.0  ;;  %v3899_v59 = vld [vmem:[%s3959_s3 + $0x4] ss:$0 sm:$0xff] }
 0x753   : > { %3375 = vmatprep.mubr.msk.f32.mxu0 %vm272_vm0, %v1859_v38 }
 0x754   : > { %vm1829_vm4 = vcmp.gt.f32.partialorder %v1807_v37, 0.0  ;;  %v1845_v57 = vmul.f32 0.01, %v1807_v37  ;;  %3376 = vmatmul.mubr.msk.f32.gmra.mxu0 %vm272_vm0, %v1860_v55  ;;  %v1862_v60 = vsel %vm1830_vm3, %v1812_v35, %v1846_v39 }
 0x756   : > { %v1861_v58 = vsel %vm1829_vm4, %v1807_v37, %v1845_v57 }
 0x757   : > { %3378 = vmatprep.mubr.msk.f32.mxu0 %vm272_vm0, %v1861_v58 }
 0x758   : > { %3379 = vmatmul.mubr.msk.f32.gmra.mxu0 %vm272_vm0, %v1862_v60 }
 0x7fc   : > { %v3359_v62 = vpop.f32.mrf.mxu0 }
 0x7fd   : > { %v1996_v63 = vadd.f32 %v3359_v62, %v3899_v59 }
 0x7fe   : > { %v1990_v0 = vpop.f32.mrf.mxu0 }
 0x7ff   : > { %v1991_v1 = vadd.f32 %v3899_v59, %v1990_v0  ;;  %v2086_v30 = vmul.f32 0.01, %v1996_v63  ;;  %vm2070_vm5 = vcmp.gt.f32.partialorder %v1996_v63, 0.0 }
 0x800   : > { %v3362_v2 = vpop.f32.mrf.mxu0 }
 0x801   : > { %vm2069_vm6 = vcmp.gt.f32.partialorder %v1991_v1, 0.0  ;;  %v2085_v3 = vmul.f32 0.01, %v1991_v1  ;;  %v2006_v4 = vadd.f32 %v3362_v2, %v3899_v59  ;;  %v2102_v8 = vsel %vm2070_vm5, %v1996_v63, %v2086_v30 }
 0x802   : > { %v2000_v5 = vpop.f32.mrf.mxu0  ;;  %v2323_v63 = vlaneseq }
 0x803   : > { %v2001_v6 = vadd.f32 %v3899_v59, %v2000_v5  ;;  %v2101_v7 = vsel %vm2069_vm6, %v1991_v1, %v2085_v3  ;;  %v2088_v9 = vmul.f32 0.01, %v2006_v4  ;;  %vm2072_vm7 = vcmp.gt.f32.partialorder %v2006_v4, 0.0 }
 0x804   : > { %v3365_v10 = vpop.f32.mrf.mxu0  ;;  %3389 = vmatprep.mubr.msk.f32.mxu1 %vm272_vm0, %v2101_v7  ;;  %v2324_v0 = vshrl.u32 %v2323_v63, 7  ;;  %v2327_v2 = vand.u32 127, %v2323_v63  ;;  %v3537_v5 = vmov 1.0  }
 0x805   : > { %vm2071_vm8 = vcmp.gt.f32.partialorder %v2001_v6, 0.0  ;;  %v2087_v11 = vmul.f32 0.01, %v2001_v6  ;;  %v2016_v56 = vadd.f32 %v3365_v10, %v3899_v59  ;;  %3390 = vmatmul.mubr.msk.f32.vlgmr.msra.gmra.mxu1 %vm272_vm0, %v2102_v8  ;;  %v2104_v40 = vsel %vm2072_vm7, %v2006_v4, %v2088_v9 }
 0x806   : > { %v2010_v12 = vpop.f32.mrf.mxu0  ;;  %v2325_v1 = vadd.s32 8, %v2324_v0 }
 0x807   : > { %v2011_v13 = vadd.f32 %v3899_v59, %v2010_v12  ;;  %v2103_v14 = vsel %vm2071_vm8, %v2001_v6, %v2087_v11  ;;  %v2090_v15 = vmul.f32 0.01, %v2016_v56  ;;  %vm2074_vm9 = vcmp.gt.f32.partialorder %v2016_v56, 0.0 }
 0x808   : > { %v3368_v16 = vpop.f32.mrf.mxu0  ;;  %3392 = vmatprep.mubr.msk.f32.mxu1 %vm272_vm0, %v2103_v14  ;;  %v2329_v30 = vmul.u32 8, %v2325_v1 }
 0x809   : > { %vm2073_vm10 = vcmp.gt.f32.partialorder %v2011_v13, 0.0  ;;  %v2089_v42 = vmul.f32 0.01, %v2011_v13  ;;  %v2026_v43 = vadd.f32 %v3368_v16, %v3899_v59  ;;  %3393 = vmatmul.mubr.msk.f32.gmra.mxu1 %vm272_vm0, %v2104_v40  ;;  %v2106_v48 = vsel %vm2074_vm9, %v2016_v56, %v2090_v15 }
 0x80a   : > { %v2020_v44 = vpop.f32.mrf.mxu0  ;;  %v2333_v4 = vadd.s32 8, %v2329_v30  ;;  %vm2331_vm9 = vcmp.ge.s32.totalorder %v2327_v2, %v2329_v30 }
 0x80b   : > { %v2021_v41 = vadd.f32 %v3899_v59, %v2020_v44  ;;  %v2105_v45 = vsel %vm2073_vm10, %v2011_v13, %v2089_v42  ;;  %v2092_v46 = vmul.f32 0.01, %v2026_v43  ;;  %vm2076_vm11 = vcmp.gt.f32.partialorder %v2026_v43, 0.0  ;;  %v2697_v44 = vld [vmem:[%s3959_s3 + $0x5] ss:$0 sm:$0xff] }
 0x80c   : > { %v3371_v47 = vpop.f32.mrf.mxu0  ;;  %3395 = vmatprep.mubr.msk.f32.mxu1 %vm272_vm0, %v2105_v45  ;;  %vm2335_vm10 = vcmp.lt.s32.totalorder %v2327_v2, %v2333_v4 }
 0x80d   : > { %vm2075_vm12 = vcmp.gt.f32.partialorder %v2021_v41, 0.0  ;;  %v2091_v20 = vmul.f32 0.01, %v2021_v41  ;;  %v2036_v49 = vadd.f32 %v3371_v47, %v3899_v59  ;;  %3396 = vmatmul.mubr.msk.f32.gmra.mxu1 %vm272_vm0, %v2106_v48  ;;  %v2108_v17 = vsel %vm2076_vm11, %v2026_v43, %v2092_v46  ;;  %vm3934_vm11 = vmand %vm2331_vm9, %vm2335_vm10 }
 0x80e   : > { %v2030_v50 = vpop.f32.mrf.mxu0 }
 0x80f   : > { %v2031_v51 = vadd.f32 %v3899_v59, %v2030_v50  ;;  %v2107_v52 = vsel %vm2075_vm12, %v2021_v41, %v2091_v20  ;;  %v2094_v53 = vmul.f32 0.01, %v2036_v49  ;;  %vm2078_vm13 = vcmp.gt.f32.partialorder %v2036_v49, 0.0 }
 0x810   : > { %v3374_v54 = vpop.f32.mrf.mxu0  ;;  %3398 = vmatprep.mubr.msk.f32.mxu1 %vm272_vm0, %v2107_v52  ;;  %vm2511_vm12 = vcmask 7168  }
 0x811   : > { %vm2077_vm14 = vcmp.gt.f32.partialorder %v2031_v51, 0.0  ;;  %v2093_v18 = vmul.f32 0.01, %v2031_v51  ;;  %v2046_v19 = vadd.f32 %v3374_v54, %v3899_v59  ;;  %3399 = vmatmul.mubr.msk.f32.gmra.mxu1 %vm272_vm0, %v2108_v17  ;;  %v2110_v26 = vsel %vm2078_vm13, %v2036_v49, %v2094_v53 }
 0x812   : > { %v2040_v21 = vpop.f32.mrf.mxu0 }
 0x813   : > { %v2041_v22 = vadd.f32 %v3899_v59, %v2040_v21  ;;  %v2109_v23 = vsel %vm2077_vm14, %v2031_v51, %v2093_v18  ;;  %v2096_v24 = vmul.f32 0.01, %v2046_v19  ;;  %vm2080_vm15 = vcmp.gt.f32.partialorder %v2046_v19, 0.0 }
 0x814   : > { %v3377_v25 = vpop.f32.mrf.mxu0  ;;  %3401 = vmatprep.mubr.msk.f32.mxu1 %vm272_vm0, %v2109_v23 }
 0x815   : > { %vm2079_vm1 = vcmp.gt.f32.partialorder %v2041_v22, 0.0  ;;  %v2095_v27 = vmul.f32 0.01, %v2041_v22  ;;  %v2056_v28 = vadd.f32 %v3377_v25, %v3899_v59  ;;  %3402 = vmatmul.mubr.msk.f32.gmra.mxu1 %vm272_vm0, %v2110_v26  ;;  %v2112_v35 = vsel %vm2080_vm15, %v2046_v19, %v2096_v24  ;;  %v2421_v24 = vld [vmem:[#allocation2 + $0xd8] sm:$0xff]  ;;  %v2420_v25 = vld [vmem:[#allocation2 + $0xd0] sm:$0xff]  ;;  %v2419_v26 = vld [vmem:[#allocation2 + $0xc8] sm:$0xff] }
 0x816   : > { %v2050_v29 = vpop.f32.mrf.mxu0 }
 0x817   : > { %v2051_v31 = vadd.f32 %v3899_v59, %v2050_v29  ;;  %v2111_v32 = vsel %vm2079_vm1, %v2041_v22, %v2095_v27  ;;  %v2098_v33 = vmul.f32 0.01, %v2056_v28  ;;  %vm2082_vm2 = vcmp.gt.f32.partialorder %v2056_v28, 0.0  ;;  %v2418_v27 = vld [vmem:[#allocation2 + $0xc0] sm:$0xff] }
 0x818   : > { %v3380_v34 = vpop.f32.mrf.mxu0  ;;  %3404 = vmatprep.mubr.msk.f32.mxu1 %vm272_vm0, %v2111_v32  ;;  %v2719_v32 = vld [vmem:[%s3959_s3 + $0x6] ss:$0 sm:$0xff] }
 0x819   : > { %vm2081_vm3 = vcmp.gt.f32.partialorder %v2051_v31, 0.0  ;;  %v2097_v36 = vmul.f32 0.01, %v2051_v31  ;;  %v2066_v37 = vadd.f32 %v3380_v34, %v3899_v59  ;;  %3405 = vmatmul.mubr.msk.f32.gmra.mxu1 %vm272_vm0, %v2112_v35  ;;  %v2114_v58 = vsel %vm2082_vm2, %v2056_v28, %v2098_v33 }
 0x81a   : > { %v2060_v38 = vpop.f32.mrf.mxu0 }
 0x81b   : > { %v2061_v39 = vadd.f32 %v3899_v59, %v2060_v38  ;;  %v2113_v55 = vsel %vm2081_vm3, %v2051_v31, %v2097_v36  ;;  %v2100_v57 = vmul.f32 0.01, %v2066_v37  ;;  %vm2084_vm4 = vcmp.gt.f32.partialorder %v2066_v37, 0.0 }
 0x81c   : > { %3407 = vmatprep.mubr.msk.f32.mxu1 %vm272_vm0, %v2113_v55  ;;  %v2328_v59 = vmul.u32 8, %v2324_v0 }
 0x81d   : > { %vm2083_vm5 = vcmp.gt.f32.partialorder %v2061_v39, 0.0  ;;  %v2099_v60 = vmul.f32 0.01, %v2061_v39  ;;  %3408 = vmatmul.mubr.msk.f32.gmra.mxu1 %vm272_vm0, %v2114_v58  ;;  %v2116_v62 = vsel %vm2084_vm4, %v2066_v37, %v2100_v57 }
 0x81e   : > { %v2332_v3 = vadd.s32 8, %v2328_v59  ;;  %vm2330_vm6 = vcmp.ge.s32.totalorder %v2327_v2, %v2328_v59 }
 0x81f   : > { %v2115_v61 = vsel %vm2083_vm5, %v2061_v39, %v2099_v60 }
 0x820   : > { %3410 = vmatprep.mubr.msk.f32.mxu1 %vm272_vm0, %v2115_v61  ;;  %vm2334_vm7 = vcmp.lt.s32.totalorder %v2327_v2, %v2332_v3 }
 0x821   : > { %3411 = vmatmul.mubr.msk.f32.gmra.mxu1 %vm272_vm0, %v2116_v62  ;;  %vm2336_vm8 = vmand %vm2330_vm6, %vm2334_vm7 }
 0x822   : > { %3445 = vmatprep.mubr.msk.f32.mxu0 %vm2336_vm8, %v3537_v5 }
 0x8c5   : > { %v3391_v7 = vpop.f32.mrf.mxu1 }
 0x8c6   : > { %v2250_v22 = vadd.f32 %v3391_v7, %v2697_v44 }
 0x8c7   : > { %v2244_v8 = vpop.f32.mrf.mxu1 }
 0x8c8   : > { %v2245_v23 = vadd.f32 %v2697_v44, %v2244_v8 }
 0x8c9   : > { %v3394_v9 = vpop.f32.mrf.mxu1 }
 0x8ca   : > { %v2260_v19 = vadd.f32 %v3394_v9, %v2697_v44 }
 0x8cb   : > { %v2254_v10 = vpop.f32.mrf.mxu1 }
 0x8cc   : > { %v2255_v21 = vadd.f32 %v2697_v44, %v2254_v10 }
 0x8cd   : > { %v3397_v11 = vpop.f32.mrf.mxu1 }
 0x8ce   : > { %v2270_v17 = vadd.f32 %v3397_v11, %v2697_v44 }
 0x8cf   : > { %v2264_v56 = vpop.f32.mrf.mxu1 }
 0x8d0   : > { %v2265_v18 = vadd.f32 %v2697_v44, %v2264_v56 }
 0x8d1   : > { %v3400_v12 = vpop.f32.mrf.mxu1 }
 0x8d2   : > { %v2280_v53 = vadd.f32 %v3400_v12, %v2697_v44 }
 0x8d3   : > { %v2274_v13 = vpop.f32.mrf.mxu1 }
 0x8d4   : > { %v2275_v54 = vadd.f32 %v2697_v44, %v2274_v13 }
 0x8d5   : > { %v3403_v14 = vpop.f32.mrf.mxu1 }
 0x8d6   : > { %v2290_v51 = vadd.f32 %v3403_v14, %v2697_v44 }
 0x8d7   : > { %v2284_v15 = vpop.f32.mrf.mxu1 }
 0x8d8   : > { %v2285_v52 = vadd.f32 %v2697_v44, %v2284_v15 }
 0x8d9   : > { %v3406_v16 = vpop.f32.mrf.mxu1 }
 0x8da   : > { %v2300_v49 = vadd.f32 %v3406_v16, %v2697_v44 }
 0x8db   : > { %v2294_v40 = vpop.f32.mrf.mxu1 }
 0x8dc   : > { %v2295_v50 = vadd.f32 %v2697_v44, %v2294_v40 }
 0x8dd   : > { %v3409_v42 = vpop.f32.mrf.mxu1 }
 0x8de   : > { %v2310_v48 = vadd.f32 %v3409_v42, %v2697_v44 }
 0x8df   : > { %v2304_v43 = vpop.f32.mrf.mxu1 }
 0x8e0   : > { %v2305_v20 = vadd.f32 %v2697_v44, %v2304_v43 }
 0x8e1   : > { %v3412_v41 = vpop.f32.mrf.mxu1 }
 0x8e2   : > { %v2320_v45 = vadd.f32 %v3412_v41, %v2697_v44 }
 0x8e3   : > { %v2314_v46 = vpop.f32.mrf.mxu1 }
 0x8e4   : > { %v2315_v47 = vadd.f32 %v2697_v44, %v2314_v46  ;;  %3413 = vmatprep.subr.mxu0 %v2320_v45 }
 0x8e5   : > { %3414 = vmatpush3.msra.mxu0 %v2320_v45 }
 0x8e6   : > { %3415 = vmatprep.subr.mxu0 %v2315_v47 }
 0x8e7   : > { %3416 = vmatpush3.msra.mxu0 %v2315_v47 }
 0x8e8   : > { %3417 = vmatprep.subr.mxu0 %v2310_v48 }
 0x8e9   : > { %3418 = vmatpush3.msra.mxu0 %v2310_v48 }
 0x8ea   : > { %3419 = vmatprep.subr.mxu0 %v2305_v20 }
 0x8eb   : > { %3420 = vmatpush3.msra.mxu0 %v2305_v20 }
 0x8ec   : > { %3421 = vmatprep.subr.mxu0 %v2300_v49 }
 0x8ed   : > { %3422 = vmatpush3.msra.mxu0 %v2300_v49 }
 0x8ee   : > { %3423 = vmatprep.subr.mxu0 %v2295_v50 }
 0x8ef   : > { %3424 = vmatpush3.msra.mxu0 %v2295_v50 }
 0x8f0   : > { %3425 = vmatprep.subr.mxu0 %v2290_v51 }
 0x8f1   : > { %3426 = vmatpush3.msra.mxu0 %v2290_v51 }
 0x8f2   : > { %3427 = vmatprep.subr.mxu0 %v2285_v52 }
 0x8f3   : > { %3428 = vmatpush3.msra.mxu0 %v2285_v52 }
 0x8f4   : > { %3429 = vmatprep.subr.mxu0 %v2280_v53 }
 0x8f5   : > { %3430 = vmatpush3.msra.mxu0 %v2280_v53 }
 0x8f6   : > { %3431 = vmatprep.subr.mxu0 %v2275_v54 }
 0x8f7   : > { %3432 = vmatpush3.msra.mxu0 %v2275_v54 }
 0x8f8   : > { %3433 = vmatprep.subr.mxu0 %v2270_v17 }
 0x8f9   : > { %3434 = vmatpush3.msra.mxu0 %v2270_v17 }
 0x8fa   : > { %3435 = vmatprep.subr.mxu0 %v2265_v18 }
 0x8fb   : > { %3436 = vmatpush3.msra.mxu0 %v2265_v18 }
 0x8fc   : > { %3437 = vmatprep.subr.mxu0 %v2260_v19 }
 0x8fd   : > { %3438 = vmatpush3.msra.mxu0 %v2260_v19 }
 0x8fe   : > { %3439 = vmatprep.subr.mxu0 %v2255_v21 }
 0x8ff   : > { %3440 = vmatpush3.msra.mxu0 %v2255_v21 }
 0x900   : > { %3441 = vmatprep.subr.mxu0 %v2250_v22 }
 0x901   : > { %3442 = vmatpush3.msra.mxu0 %v2250_v22 }
 0x902   : > { %3443 = vmatprep.subr.mxu0 %v2245_v23 }
 0x903   : > { %3444 = vmatpush3.msra.mxu0 %v2245_v23 }
 0x904   : > { %3446 = vmatmul.mubr.msk.f32.vlgmr.msra.gmra.mxu0 %vm3934_vm11, %v3537_v5  ;;  %3448 = vmatprep.subr.mxu0 %v2421_v24 }
 0x905   : > { %3449 = vmatpush3.msra.mxu0 %v2421_v24 }
 0x906   : > { %3450 = vmatprep.subr.mxu0 %v2420_v25 }
 0x907   : > { %3451 = vmatpush3.msra.mxu0 %v2420_v25 }
 0x908   : > { %3452 = vmatprep.subr.mxu0 %v2419_v26 }
 0x909   : > { %3453 = vmatpush3.msra.mxu0 %v2419_v26 }
 0x90a   : > { %3454 = vmatprep.subr.mxu0 %v2418_v27 }
 0x90b   : > { %3455 = vmatpush3.msra.mxu0 %v2418_v27 }
 0x9c4   : > { %v3447_v28 = vpop.f32.mrf.mxu0 }
 0x9c6   : > { %v2408_v29 = vpop.f32.mrf.mxu0 }
 0x9c7   : > { %3456 = vmatprep.mubr.msk.f32.mxu0 %vm272_vm0, %v2408_v29 }
 0x9c8   : > { %3457 = vmatmul.mubr.msk.f32.vlgmr.msra.gmra.mxu0 %vm272_vm0, %v3447_v28 }
 0xa88   : > { %v3458_v31 = vpop.f32.mrf.mxu0 }
 0xa89   : > { %v2508_v35 = vadd.f32 %v3458_v31, %v2719_v32 }
 0xa8a   : > { %v2502_v33 = vpop.f32.mrf.mxu0 }
 0xa8b   : > { %v2503_v34 = vadd.f32 %v2719_v32, %v2502_v33  ;;  %2513 = vst.msk [vmem:[%s234_s29 + $0x8] sm:$0xff] %vm2511_vm12, %v2508_v35 }
 0xa8d   : > { %2512 = vst.msk [vmem:[%s234_s29] sm:$0xff] %vm2511_vm12, %v2503_v34 }
 0xa8e PF: > { %s15_s15 = sadd.s32 1, %s3532_s15  }
 0xa8f   : > { %p12_p3 = scmp.ge.s32.totalorder %s15_s15, 4  }
 0xa91   :  { %14 = sbr.rel (!%p12_p3) target bundleno = 1 (0x1), region = 86 }
 0xa96   :  { %2536 = vsyncpa [#allocation3], 1 }
 0xa97   :  { %2538 = vsyncpa [#allocation3 + $0x1], 1 }

</bundles_post_ra>
